<compile_context>
chip_gen: v5e
topology: v5e:2x2
jax: 0.10.0
libtpu: 0.0.40
codegen_flags: <defaults>
</compile_context>

<pallas_src>
import jax
import jax.numpy as jnp
import numpy as np
from jax.experimental import pallas as pl
from jax.experimental.pallas import tpu as pltpu

EPS = 1e-5  # torch.nn.LayerNorm default eps


def _layer_norm(y, gamma, beta):
    mu = jnp.mean(y, axis=-1, keepdims=True)
    var = jnp.mean((y - mu) ** 2, axis=-1, keepdims=True)
    return (y - mu) * jax.lax.rsqrt(var + EPS) * gamma + beta


def _round_up(x, m):
    return ((int(x) + m - 1) // m) * m


def _lane(x):
    """Lane width a minor dim occupies in VMEM/vregs (padded to 128)."""
    return _round_up(max(int(x), 1), 128)


def _padded_bytes(a):
    """VMEM bytes of a small 2-D slab in its (8,128)/(16,128) tiled layout."""
    rows = int(np.prod(a.shape[:-1])) if a.ndim > 1 else 1
    return _round_up(rows, 8) * _lane(a.shape[-1]) * a.dtype.itemsize


def _vmem_budget():
    """(per-step tile budget, vmem_limit_bytes) for the current TPU generation."""
    cap = 64 << 20  # conservative default: assume v7x-sized VMEM
    try:
        info = pltpu.get_tpu_info()
        for attr in ("vmem_capacity_bytes", "vmem_bytes", "vmem_size_bytes"):
            val = getattr(info, attr, None)
            if val:
                cap = int(val)
                break
    except Exception:
        pass
    if cap >= (96 << 20):          # v5e / v6e: 128 MiB VMEM per TensorCore
        return 48 << 20, 96 << 20
    return 18 << 20, 40 << 20      # v7x: 64 MiB VMEM per TensorCore


def _pick_row_tile(*, N, B, H2, nef_in, nef_out, nnf_out, out_itemsize,
                   weight_bytes, budget_bytes, dense_out):
    """Largest i-row tile TI (multiple of 8) whose padded working set fits."""
    np8 = _round_up(max(N, 8), 8)
    # Fixed per-step cost: hj block (all j rows, double-buffered) + weight
    # slabs (double-buffered) + compiler scratch slack.
    fixed = 2 * np8 * _lane(H2) * 4 + 2 * weight_bytes + (2 << 20)
    # Honest per-i-row cost, using padded VMEM layouts (narrow minor dims such
    # as nef_in/nef_out/nnf_out occupy a full 128-lane tile).
    per_row = 2 * _lane(H2) * 4                         # hi input (f32, x2 buffers)
    per_row += 2 * np8 * _lane(nef_in) * 2              # edge input (bf16, x2)
    per_row += 2 * _lane(nnf_out) * out_itemsize        # node output (x2)
    if dense_out:
        per_row += 2 * _lane(np8 * nef_out) * out_itemsize   # lane-dense edge out
    else:
        per_row += 2 * np8 * _lane(nef_out) * out_itemsize   # feature-minor edge out
    per_row += 3 * np8 * _lane(H2) * 4                  # he / h1 / h2 f32 intermediates
    per_row += 2 * np8 * _lane(H2) * 2                  # bf16 copies of h1 / h2 (MXU in)
    per_row += np8 * _lane(nef_out) * 4                 # f32 edge-head result pre-store
    ti = (budget_bytes - fixed) // per_row
    ti = max(8, (int(ti) // 8) * 8)
    ti = min(ti, np8)
    # Keep at least 2 grid steps so both v7x TensorCores get work
    # (no-op on single-TC v5e/v6e).
    n_it = _round_up(N, ti) // ti
    if B * n_it < 2 and ti >= 16:
        ti = max(8, (ti // 2 // 8) * 8)
    return ti


def gnn_forward(node_feat, edge_feat, params, *, lane_dense_edge_out=True):
    """Forward pass of `Gnn` (layer_norm, skip_connection=False, edge_feat given)."""
    f32, bf16 = jnp.float32, jnp.bfloat16
    B, N, nnf_in = node_feat.shape
    nef_in = edge_feat.shape[-1]
    H = params["we2"].shape[0]
    H2 = 2 * H
    nef_out = params["we3"].shape[-1]
    nnf_out = params["wn3"].shape[-1]
    out_dtype = node_feat.dtype
    out_itemsize = jnp.dtype(out_dtype).itemsize
    split_heads = (H % 128 == 0)   # lane-aligned slices are only free then

    # ---- first-layer per-node contributions, precomputed in plain XLA -------
    # (b1 is folded into the j contribution; the kernel only broadcast-adds.)
    w1 = jnp.concatenate([params["we1"], params["wn1"]], axis=1).astype(f32)  # (Fin, 2H)
    b1 = jnp.concatenate([params["be1"], params["bn1"]], axis=1).astype(f32)  # (1, 2H)
    nodes = node_feat.astype(f32)
    hj = nodes @ w1[:nnf_in] + b1                 # (B, N, 2H), added along the j axis
    hi = nodes @ w1[nnf_in:2 * nnf_in]            # (B, N, 2H), added along the i axis
    w1_e = w1[2 * nnf_in:].astype(bf16)           # (nef_in, 2H)

    # ---- layer-2 / head weight slabs -----------------------------------------
    if split_heads:
        # H multiple of 128: run the two MLPs with unpadded weights and free
        # lane slices of h1 (no doubled MXU work from block-diagonal padding).
        mats = [w1_e,
                params["we2"].astype(bf16), params["be2"].astype(f32),
                params["wn2"].astype(bf16), params["bn2"].astype(f32),
                params["we3"].astype(bf16), params["be3"].astype(f32),
                params["wn3"].astype(f32), params["bn3"].astype(f32)]
    else:
        # H < 128: fuse the two MLPs into one MXU pass (block-diagonal layer 2,
        # zero-padded heads) so no sub-128-lane slicing is needed in-kernel.
        zH = jnp.zeros((H, H), f32)
        w2 = jnp.concatenate(
            [jnp.concatenate([params["we2"].astype(f32), zH], axis=1),
             jnp.concatenate([zH, params["wn2"].astype(f32)], axis=1)], axis=0)
        b2 = jnp.concatenate([params["be2"], params["bn2"]], axis=1).astype(f32)
        we3p = jnp.concatenate(
            [params["we3"].astype(f32), jnp.zeros((H, nef_out), f32)], axis=0)
        wn3p = jnp.concatenate(
            [jnp.zeros((H, nnf_out), f32), params["wn3"].astype(f32)], axis=0)
        mats = [w1_e,
                w2.astype(bf16), b2,
                we3p.astype(bf16), params["be3"].astype(f32),
                wn3p, params["bn3"].astype(f32)]
    ln_params = [params["eg"].astype(f32), params["ebeta"].astype(f32),
                 params["ng"].astype(f32), params["nbeta"].astype(f32)]

    # ---- i-row tile & padded node count from an honest VMEM budget ----------
    budget, vmem_limit = _vmem_budget()
    weight_bytes = sum(_padded_bytes(a) for a in mats + ln_params)
    TI = _pick_row_tile(N=N, B=B, H2=H2, nef_in=nef_in, nef_out=nef_out,
                        nnf_out=nnf_out, out_itemsize=out_itemsize,
                        weight_bytes=weight_bytes, budget_bytes=budget,
                        dense_out=lane_dense_edge_out)
    Np = _round_up(N, TI)          # pad i/j so TI always divides the row count
    n_it = Np // TI

    # ---- pad + cast the streamed operands ------------------------------------
    edge_in = edge_feat
    if Np != N:
        pad = Np - N
        hj = jnp.pad(hj, ((0, 0), (0, pad), (0, 0)))
        hi = jnp.pad(hi, ((0, 0), (0, pad), (0, 0)))
        edge_in = jnp.pad(edge_in, ((0, 0), (0, pad), (0, pad), (0, 0)))
    # bf16 streaming halves HBM traffic and VMEM for the dominant edge tensor.
    edge_in = edge_in.astype(bf16).reshape(B, Np * Np, nef_in)

    # ---- kernel ---------------------------------------------------------------
    def first_layer(hj_ref, hi_ref, edge_ref, w1e_ref):
        he = jnp.dot(edge_ref[...], w1e_ref[...],
                     preferred_element_type=f32)                       # (TI*Np, 2H)
        h1 = (he.reshape(TI, Np, H2)
              + hi_ref[...][:, None, :]          # node[i] contribution
              + hj_ref[...][None, :, :])         # node[j] contribution (+ b1)
        return jnp.maximum(h1, 0.0).reshape(TI * Np, H2).astype(bf16)

    def edge_head(h2e, we3_ref, be3_ref, eg_ref, ebeta_ref, edge_out_ref):
        e = jnp.dot(h2e.astype(bf16), we3_ref[...],
                    preferred_element_type=f32) + be3_ref[...]
        e = _layer_norm(e, eg_ref[...], ebeta_ref[...])
        if lane_dense_edge_out:
            # Lane-dense store: one in-kernel relayout buys unmasked vst and a
            # ~25x smaller edge-output double buffer.
            edge_out_ref[...] = e.reshape(TI, Np * nef_out).astype(edge_out_ref.dtype)
        else:
            edge_out_ref[...] = e.reshape(TI, Np, nef_out).astype(edge_out_ref.dtype)

    def node_head(h2n, wn3_ref, bn3_ref, ng_ref, nbeta_ref, node_out_ref):
        h2n = h2n.reshape(TI, Np, h2n.shape[-1])
        if Np != N:  # zero the padded j rows before the sum
            jmask = jax.lax.broadcasted_iota(jnp.int32, (TI, Np, 1), 1) < N
            h2n = jnp.where(jmask, h2n, 0.0)
        h2_sum = h2n.sum(axis=1)                                       # (TI, H or 2H)
        # The sum over j commutes with the (linear) last layer; N real j rows.
        n = jnp.dot(h2_sum, wn3_ref[...], preferred_element_type=f32) + N * bn3_ref[...]
        n = _layer_norm(n, ng_ref[...], nbeta_ref[...])
        node_out_ref[...] = n.astype(node_out_ref.dtype)

    if split_heads:
        def kernel(hj_ref, hi_ref, edge_ref, w1e_ref,
                   we2_ref, be2_ref, wn2_ref, bn2_ref,
                   we3_ref, be3_ref, wn3_ref, bn3_ref,
                   eg_ref, ebeta_ref, ng_ref, nbeta_ref,
                   node_out_ref, edge_out_ref):
            h1 = first_layer(hj_ref, hi_ref, edge_ref, w1e_ref)
            h2e = jnp.maximum(jnp.dot(h1[:, :H], we2_ref[...],
                                      preferred_element_type=f32) + be2_ref[...], 0.0)
            h2n = jnp.maximum(jnp.dot(h1[:, H:], wn2_ref[...],
                                      preferred_element_type=f32) + bn2_ref[...], 0.0)
            edge_head(h2e, we3_ref, be3_ref, eg_ref, ebeta_ref, edge_out_ref)
            node_head(h2n, wn3_ref, bn3_ref, ng_ref, nbeta_ref, node_out_ref)
    else:
        def kernel(hj_ref, hi_ref, edge_ref, w1e_ref,
                   w2_ref, b2_ref, we3_ref, be3_ref, wn3_ref, bn3_ref,
                   eg_ref, ebeta_ref, ng_ref, nbeta_ref,
                   node_out_ref, edge_out_ref):
            h1 = first_layer(hj_ref, hi_ref, edge_ref, w1e_ref)
            h2 = jnp.maximum(jnp.dot(h1, w2_ref[...],
                                     preferred_element_type=f32) + b2_ref[...], 0.0)
            edge_head(h2, we3_ref, be3_ref, eg_ref, ebeta_ref, edge_out_ref)
            node_head(h2, wn3_ref, bn3_ref, ng_ref, nbeta_ref, node_out_ref)

    # ---- specs ----------------------------------------------------------------
    def const_spec(a):
        nd = a.ndim
        return pl.BlockSpec(a.shape, lambda b, it, _n=nd: (0,) * _n)

    in_specs = [
        pl.BlockSpec((None, Np, H2), lambda b, it: (b, 0, 0)),            # hj (all j)
        pl.BlockSpec((None, TI, H2), lambda b, it: (b, it, 0)),           # hi (i-tile)
        pl.BlockSpec((None, TI * Np, nef_in), lambda b, it: (b, it, 0)),  # edge rows
        # TODO(synk): add pipeline_mode=pl.Buffered(3) on the edge in/out specs
        # only if an xprof trace still shows exposed DMA after these fixes.
    ] + [const_spec(a) for a in mats + ln_params]

    node_out_shape = jax.ShapeDtypeStruct((B, Np, nnf_out), out_dtype)
    node_out_spec = pl.BlockSpec((None, TI, nnf_out), lambda b, it: (b, it, 0))
    if lane_dense_edge_out:
        edge_out_shape = jax.ShapeDtypeStruct((B, Np, Np * nef_out), out_dtype)
        edge_out_spec = pl.BlockSpec((None, TI, Np * nef_out), lambda b, it: (b, it, 0))
    else:
        edge_out_shape = jax.ShapeDtypeStruct((B, Np, Np, nef_out), out_dtype)
        edge_out_spec = pl.BlockSpec((None, TI, Np, nef_out),
                                     lambda b, it: (b, it, 0, 0))

    node_out, edge_out = pl.pallas_call(
        kernel,
        grid=(B, n_it),
        in_specs=in_specs,
        out_specs=(node_out_spec, edge_out_spec),
        out_shape=(node_out_shape, edge_out_shape),
        compiler_params=pltpu.CompilerParams(
            dimension_semantics=("parallel", "parallel"),
            vmem_limit_bytes=vmem_limit),
    )(hj, hi, edge_in, *mats, *ln_params)

    edge_out = edge_out.reshape(B, Np, Np, nef_out)
    return node_out[:, :N], edge_out[:, :N, :N]


# ------------------ pure-f32 reference (sanity check) ------------------------
def _mlp_ref(x, w1, b1, w2, b2, w3, b3):
    h = jnp.maximum(x @ w1 + b1[0], 0.0)
    h = jnp.maximum(h @ w2 + b2[0], 0.0)
    return h @ w3 + b3[0]


def _ln_ref(y, g, b):
    mu = jnp.mean(y, axis=-1, keepdims=True)
    var = jnp.mean((y - mu) ** 2, axis=-1, keepdims=True)
    return (y - mu) * jax.lax.rsqrt(var + EPS) * g[0] + b[0]


def gnn_ref(node_feat, edge_feat, p):
    B, N, nnf_in = node_feat.shape
    nodes_j = jnp.broadcast_to(node_feat[:, None, :, :], (B, N, N, nnf_in))
    nodes_i = jnp.broadcast_to(node_feat[:, :, None, :], (B, N, N, nnf_in))
    x = jnp.concatenate([nodes_j, nodes_i, edge_feat], axis=-1)
    e = _mlp_ref(x, p["we1"], p["be1"], p["we2"], p["be2"], p["we3"], p["be3"])
    n = _mlp_ref(x, p["wn1"], p["bn1"], p["wn2"], p["bn2"], p["wn3"], p["bn3"])
    n = n.sum(axis=2)  # sum over j
    return _ln_ref(n, p["ng"], p["nbeta"]), _ln_ref(e, p["eg"], p["ebeta"])


# ----- mixed-precision reference mirroring the kernel's bf16/f32 policy ------
def gnn_ref_mixed(node_feat, edge_feat, p):
    bf, f32 = jnp.bfloat16, jnp.float32
    B, N, nnf_in = node_feat.shape
    H = p["we2"].shape[0]
    w1 = jnp.concatenate([p["we1"], p["wn1"]], axis=1)
    b1 = jnp.concatenate([p["be1"], p["bn1"]], axis=1)
    hj = node_feat @ w1[:nnf_in] + b1            # along j (bias folded, f32)
    hi = node_feat @ w1[nnf_in:2 * nnf_in]       # along i (f32)
    he = jnp.einsum("bijc,ch->bijh", edge_feat.astype(bf),
                    w1[2 * nnf_in:].astype(bf), preferred_element_type=f32)
    h1 = jnp.maximum(he + hi[:, :, None, :] + hj[:, None, :, :], 0.0).astype(bf)

    def l2(h, w, b):
        return jnp.maximum(
            jnp.einsum("bijh,hk->bijk", h, w.astype(bf),
                       preferred_element_type=f32) + b[0], 0.0)

    h2e = l2(h1[..., :H], p["we2"], p["be2"])
    h2n = l2(h1[..., H:], p["wn2"], p["bn2"])
    e = jnp.einsum("bijh,hc->bijc", h2e.astype(bf), p["we3"].astype(bf),
                   preferred_element_type=f32) + p["be3"][0]
    n = h2n.sum(axis=2) @ p["wn3"] + N * p["bn3"][0]
    return _ln_ref(n, p["ng"], p["nbeta"]), _ln_ref(e, p["eg"], p["ebeta"])


if __name__ == "__main__":
    key = jax.random.PRNGKey(0)
    B, N = 2, 8
    nnf_in, nef_in = 4, 3
    nnf_out, nef_out = 6, 5
    hidden = 32            # hidden_size, n_layers=2 -> hidden=[32, 32]
    Fin = 2 * nnf_in + nef_in

    keys = jax.random.split(key, 16)

    def init(k, shape, scale=0.1):
        return (scale * jax.random.normal(k, shape)).astype(jnp.float32)

    params = {
        "we1": init(keys[0], (Fin, hidden)),      "be1": init(keys[1], (1, hidden)),
        "we2": init(keys[2], (hidden, hidden)),   "be2": init(keys[3], (1, hidden)),
        "we3": init(keys[4], (hidden, nef_out)),  "be3": init(keys[5], (1, nef_out)),
        "wn1": init(keys[6], (Fin, hidden)),      "bn1": init(keys[7], (1, hidden)),
        "wn2": init(keys[8], (hidden, hidden)),   "bn2": init(keys[9], (1, hidden)),
        "wn3": init(keys[10], (hidden, nnf_out)), "bn3": init(keys[11], (1, nnf_out)),
        # LayerNorm affine params (PyTorch default: weight=1, bias=0)
        "eg": jnp.ones((1, nef_out), jnp.float32),
        "ebeta": jnp.zeros((1, nef_out), jnp.float32),
        "ng": jnp.ones((1, nnf_out), jnp.float32),
        "nbeta": jnp.zeros((1, nnf_out), jnp.float32),
    }

    node_feat = init(keys[12], (B, N, nnf_in), scale=1.0)
    edge_feat = init(keys[13], (B, N, N, nef_in), scale=1.0)

    try:
        node_out, edge_out = gnn_forward(node_feat, edge_feat, params,
                                         lane_dense_edge_out=True)
        jax.block_until_ready((node_out, edge_out))
    except Exception:
        # TODO(synk): lane-dense edge-output relayout rejected by this Mosaic
        # version; fall back to the (previously validated) feature-minor layout.
        node_out, edge_out = gnn_forward(node_feat, edge_feat, params,
                                         lane_dense_edge_out=False)
        jax.block_until_ready((node_out, edge_out))

    # Tight check vs. a reference using the kernel's exact bf16/f32 policy.
    node_mx, edge_mx = gnn_ref_mixed(node_feat, edge_feat, params)
    np.testing.assert_allclose(np.asarray(node_out), np.asarray(node_mx),
                               rtol=5e-3, atol=5e-3)
    np.testing.assert_allclose(np.asarray(edge_out), np.asarray(edge_mx),
                               rtol=5e-3, atol=5e-3)

    # Loose sanity check vs. the full-f32 reference (bf16 MXU operands).
    node_rf, edge_rf = gnn_ref(node_feat, edge_feat, params)
    np.testing.assert_allclose(np.asarray(node_out), np.asarray(node_rf),
                               rtol=1e-1, atol=1e-1)
    np.testing.assert_allclose(np.asarray(edge_out), np.asarray(edge_rf),
                               rtol=1e-1, atol=1e-1)

    print("KERNEL_OK")
</pallas_src>

<mosaic_0001>
module attributes {stable_mosaic.version = 11 : i64} {
  func.func @kernel(%arg0: i32, %arg1: i32, %arg2: memref<1x8x64xf32, #tpu.memory_space<vmem>>, %arg3: memref<1x8x64xf32, #tpu.memory_space<vmem>>, %arg4: memref<1x64x3xbf16, #tpu.memory_space<vmem>>, %arg5: memref<3x64xbf16, #tpu.memory_space<vmem>>, %arg6: memref<64x64xbf16, #tpu.memory_space<vmem>>, %arg7: memref<1x64xf32, #tpu.memory_space<vmem>>, %arg8: memref<64x5xbf16, #tpu.memory_space<vmem>>, %arg9: memref<1x5xf32, #tpu.memory_space<vmem>>, %arg10: memref<64x6xf32, #tpu.memory_space<vmem>>, %arg11: memref<1x6xf32, #tpu.memory_space<vmem>>, %arg12: memref<1x5xf32, #tpu.memory_space<vmem>>, %arg13: memref<1x5xf32, #tpu.memory_space<vmem>>, %arg14: memref<1x6xf32, #tpu.memory_space<vmem>>, %arg15: memref<1x6xf32, #tpu.memory_space<vmem>>, %arg16: memref<1x8x6xf32, #tpu.memory_space<vmem>>, %arg17: memref<1x8x40xf32, #tpu.memory_space<vmem>>) attributes {dimension_semantics = [#tpu.dimension_semantics<parallel>, #tpu.dimension_semantics<parallel>], iteration_bounds = array<i64: 2, 1>, scalar_prefetch = 0 : i64, scratch_operands = 0 : i64, tpu.core_type = #tpu.core_type<tc>, window_params = [{transform_indices = @transform_0, window_bounds = array<i64: 1, 8, 64>}, {transform_indices = @transform_1, window_bounds = array<i64: 1, 8, 64>}, {transform_indices = @transform_2, window_bounds = array<i64: 1, 64, 3>}, {pipeline_mode = #tpu.pipeline_mode<synchronous>, transform_indices = @transform_3, window_bounds = array<i64: 3, 64>}, {pipeline_mode = #tpu.pipeline_mode<synchronous>, transform_indices = @transform_4, window_bounds = array<i64: 64, 64>}, {pipeline_mode = #tpu.pipeline_mode<synchronous>, transform_indices = @transform_5, window_bounds = array<i64: 1, 64>}, {pipeline_mode = #tpu.pipeline_mode<synchronous>, transform_indices = @transform_6, window_bounds = array<i64: 64, 5>}, {pipeline_mode = #tpu.pipeline_mode<synchronous>, transform_indices = @transform_7, window_bounds = array<i64: 1, 5>}, {pipeline_mode = #tpu.pipeline_mode<synchronous>, transform_indices = @transform_8, window_bounds = array<i64: 64, 6>}, {pipeline_mode = #tpu.pipeline_mode<synchronous>, transform_indices = @transform_9, window_bounds = array<i64: 1, 6>}, {pipeline_mode = #tpu.pipeline_mode<synchronous>, transform_indices = @transform_10, window_bounds = array<i64: 1, 5>}, {pipeline_mode = #tpu.pipeline_mode<synchronous>, transform_indices = @transform_11, window_bounds = array<i64: 1, 5>}, {pipeline_mode = #tpu.pipeline_mode<synchronous>, transform_indices = @transform_12, window_bounds = array<i64: 1, 6>}, {pipeline_mode = #tpu.pipeline_mode<synchronous>, transform_indices = @transform_13, window_bounds = array<i64: 1, 6>}, {transform_indices = @transform_14, window_bounds = array<i64: 1, 8, 6>}, {transform_indices = @transform_15, window_bounds = array<i64: 1, 8, 40>}]} {
    %c0 = arith.constant 0 : index
    %c0_0 = arith.constant 0 : index
    %c0_1 = arith.constant 0 : index
    %0 = vector.load %arg4[%c0, %c0_0, %c0_1] : memref<1x64x3xbf16, #tpu.memory_space<vmem>>, vector<1x64x3xbf16>
    %1 = vector.shape_cast %0 : vector<1x64x3xbf16> to vector<64x3xbf16>
    %c0_2 = arith.constant 0 : index
    %c0_3 = arith.constant 0 : index
    %2 = vector.load %arg5[%c0_2, %c0_3] : memref<3x64xbf16, #tpu.memory_space<vmem>>, vector<3x64xbf16>
    %cst = arith.constant dense<0.000000e+00> : vector<64x64xf32>
    %3 = tpu.matmul %1, %2, %cst {dimension_numbers = #tpu.dot_dimension_numbers<[1], [0], [0], [1], [0, 0, 1, 1], [], []>} : vector<64x3xbf16>, vector<3x64xbf16>, vector<64x64xf32> -> vector<64x64xf32>
    %4 = vector.shape_cast %3 : vector<64x64xf32> to vector<8x8x64xf32>
    %c0_4 = arith.constant 0 : index
    %c0_5 = arith.constant 0 : index
    %c0_6 = arith.constant 0 : index
    %5 = vector.load %arg3[%c0_4, %c0_5, %c0_6] : memref<1x8x64xf32, #tpu.memory_space<vmem>>, vector<1x8x64xf32>
    %6 = vector.shape_cast %5 : vector<1x8x64xf32> to vector<8x64xf32>
    %7 = vector.shape_cast %6 : vector<8x64xf32> to vector<8x1x64xf32>
    %8 = vector.broadcast %7 : vector<8x1x64xf32> to vector<8x8x64xf32>
    %9 = arith.addf %4, %8 : vector<8x8x64xf32>
    %c0_7 = arith.constant 0 : index
    %c0_8 = arith.constant 0 : index
    %c0_9 = arith.constant 0 : index
    %10 = vector.load %arg2[%c0_7, %c0_8, %c0_9] : memref<1x8x64xf32, #tpu.memory_space<vmem>>, vector<1x8x64xf32>
    %11 = vector.shape_cast %10 : vector<1x8x64xf32> to vector<8x64xf32>
    %12 = vector.shape_cast %11 : vector<8x64xf32> to vector<1x8x64xf32>
    %13 = vector.broadcast %12 : vector<1x8x64xf32> to vector<8x8x64xf32>
    %14 = arith.addf %9, %13 : vector<8x8x64xf32>
    %cst_10 = arith.constant 0.000000e+00 : f32
    %15 = vector.broadcast %cst_10 : f32 to vector<8x8x64xf32>
    %16 = arith.maximumf %14, %15 : vector<8x8x64xf32>
    %17 = vector.shape_cast %16 : vector<8x8x64xf32> to vector<64x64xf32>
    %18 = arith.truncf %17 : vector<64x64xf32> to vector<64x64xbf16>
    %c0_11 = arith.constant 0 : index
    %c0_12 = arith.constant 0 : index
    %19 = vector.load %arg6[%c0_11, %c0_12] : memref<64x64xbf16, #tpu.memory_space<vmem>>, vector<64x64xbf16>
    %cst_13 = arith.constant dense<0.000000e+00> : vector<64x64xf32>
    %20 = tpu.matmul %18, %19, %cst_13 {dimension_numbers = #tpu.dot_dimension_numbers<[1], [0], [0], [1], [0, 0, 1, 1], [], []>} : vector<64x64xbf16>, vector<64x64xbf16>, vector<64x64xf32> -> vector<64x64xf32>
    %c0_14 = arith.constant 0 : index
    %c0_15 = arith.constant 0 : index
    %21 = vector.load %arg7[%c0_14, %c0_15] : memref<1x64xf32, #tpu.memory_space<vmem>>, vector<1x64xf32>
    %22 = vector.broadcast %21 : vector<1x64xf32> to vector<64x64xf32>
    %23 = arith.addf %20, %22 : vector<64x64xf32>
    %cst_16 = arith.constant 0.000000e+00 : f32
    %24 = vector.broadcast %cst_16 : f32 to vector<64x64xf32>
    %25 = arith.maximumf %23, %24 : vector<64x64xf32>
    %26 = arith.truncf %25 : vector<64x64xf32> to vector<64x64xbf16>
    %c0_17 = arith.constant 0 : index
    %c0_18 = arith.constant 0 : index
    %27 = vector.load %arg8[%c0_17, %c0_18] : memref<64x5xbf16, #tpu.memory_space<vmem>>, vector<64x5xbf16>
    %cst_19 = arith.constant dense<0.000000e+00> : vector<64x5xf32>
    %28 = tpu.matmul %26, %27, %cst_19 {dimension_numbers = #tpu.dot_dimension_numbers<[1], [0], [0], [1], [0, 0, 1, 1], [], []>} : vector<64x64xbf16>, vector<64x5xbf16>, vector<64x5xf32> -> vector<64x5xf32>
    %c0_20 = arith.constant 0 : index
    %c0_21 = arith.constant 0 : index
    %29 = vector.load %arg9[%c0_20, %c0_21] : memref<1x5xf32, #tpu.memory_space<vmem>>, vector<1x5xf32>
    %30 = vector.broadcast %29 : vector<1x5xf32> to vector<64x5xf32>
    %31 = arith.addf %28, %30 : vector<64x5xf32>
    %c0_22 = arith.constant 0 : index
    %c0_23 = arith.constant 0 : index
    %32 = vector.load %arg12[%c0_22, %c0_23] : memref<1x5xf32, #tpu.memory_space<vmem>>, vector<1x5xf32>
    %c0_24 = arith.constant 0 : index
    %c0_25 = arith.constant 0 : index
    %33 = vector.load %arg13[%c0_24, %c0_25] : memref<1x5xf32, #tpu.memory_space<vmem>>, vector<1x5xf32>
    %cst_26 = arith.constant dense<0.000000e+00> : vector<64xf32>
    %34 = vector.multi_reduction <add>, %31, %cst_26 [1] : vector<64x5xf32> to vector<64xf32>
    %35 = vector.shape_cast %34 : vector<64xf32> to vector<64x1xf32>
    %cst_27 = arith.constant 5.000000e+00 : f32
    %36 = vector.broadcast %cst_27 : f32 to vector<64x1xf32>
    %37 = arith.divf %35, %36 : vector<64x1xf32>
    %38 = vector.broadcast %37 : vector<64x1xf32> to vector<64x5xf32>
    %39 = arith.subf %31, %38 : vector<64x5xf32>
    %40 = arith.mulf %39, %39 : vector<64x5xf32>
    %cst_28 = arith.constant dense<0.000000e+00> : vector<64xf32>
    %41 = vector.multi_reduction <add>, %40, %cst_28 [1] : vector<64x5xf32> to vector<64xf32>
    %42 = vector.shape_cast %41 : vector<64xf32> to vector<64x1xf32>
    %cst_29 = arith.constant 5.000000e+00 : f32
    %43 = vector.broadcast %cst_29 : f32 to vector<64x1xf32>
    %44 = arith.divf %42, %43 : vector<64x1xf32>
    %45 = vector.broadcast %37 : vector<64x1xf32> to vector<64x5xf32>
    %46 = arith.subf %31, %45 : vector<64x5xf32>
    %cst_30 = arith.constant 9.99999974E-6 : f32
    %47 = vector.broadcast %cst_30 : f32 to vector<64x1xf32>
    %48 = arith.addf %44, %47 : vector<64x1xf32>
    %49 = math.rsqrt %48 : vector<64x1xf32>
    %50 = vector.broadcast %49 : vector<64x1xf32> to vector<64x5xf32>
    %51 = arith.mulf %46, %50 : vector<64x5xf32>
    %52 = vector.broadcast %32 : vector<1x5xf32> to vector<64x5xf32>
    %53 = arith.mulf %51, %52 : vector<64x5xf32>
    %54 = vector.broadcast %33 : vector<1x5xf32> to vector<64x5xf32>
    %55 = arith.addf %53, %54 : vector<64x5xf32>
    %56 = vector.shape_cast %55 : vector<64x5xf32> to vector<8x40xf32>
    %c0_31 = arith.constant 0 : index
    %c0_32 = arith.constant 0 : index
    %c0_33 = arith.constant 0 : index
    %57 = vector.load %arg17[%c0_31, %c0_32, %c0_33] : memref<1x8x40xf32, #tpu.memory_space<vmem>>, vector<1x8x40xf32>
    %58 = vector.shape_cast %57 : vector<1x8x40xf32> to vector<8x40xf32>
    %59 = vector.shape_cast %56 : vector<8x40xf32> to vector<1x8x40xf32>
    tpu.vector_store %arg17[%c0_31, %c0_32, %c0_33], %59 {strides = array<i32>} : memref<1x8x40xf32, #tpu.memory_space<vmem>>, vector<1x8x40xf32>,
    %60 = vector.shape_cast %25 : vector<64x64xf32> to vector<8x8x64xf32>
    %cst_34 = arith.constant dense<0.000000e+00> : vector<8x64xf32>
    %61 = vector.multi_reduction <add>, %60, %cst_34 [1] : vector<8x8x64xf32> to vector<8x64xf32>
    %c0_35 = arith.constant 0 : index
    %c0_36 = arith.constant 0 : index
    %62 = vector.load %arg10[%c0_35, %c0_36] : memref<64x6xf32, #tpu.memory_space<vmem>>, vector<64x6xf32>
    %cst_37 = arith.constant dense<0.000000e+00> : vector<8x6xf32>
    %63 = tpu.matmul %61, %62, %cst_37 {dimension_numbers = #tpu.dot_dimension_numbers<[1], [0], [0], [1], [0, 0, 1, 1], [], []>} : vector<8x64xf32>, vector<64x6xf32>, vector<8x6xf32> -> vector<8x6xf32>
    %c0_38 = arith.constant 0 : index
    %c0_39 = arith.constant 0 : index
    %64 = vector.load %arg11[%c0_38, %c0_39] : memref<1x6xf32, #tpu.memory_space<vmem>>, vector<1x6xf32>
    %cst_40 = arith.constant 8.000000e+00 : f32
    %65 = vector.broadcast %cst_40 : f32 to vector<1x6xf32>
    %66 = arith.mulf %65, %64 : vector<1x6xf32>
    %67 = vector.broadcast %66 : vector<1x6xf32> to vector<8x6xf32>
    %68 = arith.addf %63, %67 : vector<8x6xf32>
    %c0_41 = arith.constant 0 : index
    %c0_42 = arith.constant 0 : index
    %69 = vector.load %arg14[%c0_41, %c0_42] : memref<1x6xf32, #tpu.memory_space<vmem>>, vector<1x6xf32>
    %c0_43 = arith.constant 0 : index
    %c0_44 = arith.constant 0 : index
    %70 = vector.load %arg15[%c0_43, %c0_44] : memref<1x6xf32, #tpu.memory_space<vmem>>, vector<1x6xf32>
    %cst_45 = arith.constant dense<0.000000e+00> : vector<8xf32>
    %71 = vector.multi_reduction <add>, %68, %cst_45 [1] : vector<8x6xf32> to vector<8xf32>
    %72 = vector.shape_cast %71 : vector<8xf32> to vector<8x1xf32>
    %cst_46 = arith.constant 6.000000e+00 : f32
    %73 = vector.broadcast %cst_46 : f32 to vector<8x1xf32>
    %74 = arith.divf %72, %73 : vector<8x1xf32>
    %75 = vector.broadcast %74 : vector<8x1xf32> to vector<8x6xf32>
    %76 = arith.subf %68, %75 : vector<8x6xf32>
    %77 = arith.mulf %76, %76 : vector<8x6xf32>
    %cst_47 = arith.constant dense<0.000000e+00> : vector<8xf32>
    %78 = vector.multi_reduction <add>, %77, %cst_47 [1] : vector<8x6xf32> to vector<8xf32>
    %79 = vector.shape_cast %78 : vector<8xf32> to vector<8x1xf32>
    %cst_48 = arith.constant 6.000000e+00 : f32
    %80 = vector.broadcast %cst_48 : f32 to vector<8x1xf32>
    %81 = arith.divf %79, %80 : vector<8x1xf32>
    %82 = vector.broadcast %74 : vector<8x1xf32> to vector<8x6xf32>
    %83 = arith.subf %68, %82 : vector<8x6xf32>
    %cst_49 = arith.constant 9.99999974E-6 : f32
    %84 = vector.broadcast %cst_49 : f32 to vector<8x1xf32>
    %85 = arith.addf %81, %84 : vector<8x1xf32>
    %86 = math.rsqrt %85 : vector<8x1xf32>
    %87 = vector.broadcast %86 : vector<8x1xf32> to vector<8x6xf32>
    %88 = arith.mulf %83, %87 : vector<8x6xf32>
    %89 = vector.broadcast %69 : vector<1x6xf32> to vector<8x6xf32>
    %90 = arith.mulf %88, %89 : vector<8x6xf32>
    %91 = vector.broadcast %70 : vector<1x6xf32> to vector<8x6xf32>
    %92 = arith.addf %90, %91 : vector<8x6xf32>
    %c0_50 = arith.constant 0 : index
    %c0_51 = arith.constant 0 : index
    %c0_52 = arith.constant 0 : index
    %93 = vector.load %arg16[%c0_50, %c0_51, %c0_52] : memref<1x8x6xf32, #tpu.memory_space<vmem>>, vector<1x8x6xf32>
    %94 = vector.shape_cast %93 : vector<1x8x6xf32> to vector<8x6xf32>
    %95 = vector.shape_cast %92 : vector<8x6xf32> to vector<1x8x6xf32>
    tpu.vector_store %arg16[%c0_50, %c0_51, %c0_52], %95 {strides = array<i32>} : memref<1x8x6xf32, #tpu.memory_space<vmem>>, vector<1x8x6xf32>,
    return
  }
  func.func @transform_0(%arg0: i32, %arg1: i32) -> (i32, i32, i32) {
    %c0_i32 = arith.constant 0 : i32
    %c0_i32_0 = arith.constant 0 : i32
    %c0_i32_1 = arith.constant 0 : i32
    return %arg0, %c0_i32, %c0_i32_0 : i32, i32, i32
  }
  func.func @transform_1(%arg0: i32, %arg1: i32) -> (i32, i32, i32) {
    %c0_i32 = arith.constant 0 : i32
    %c0_i32_0 = arith.constant 0 : i32
    return %arg0, %arg1, %c0_i32 : i32, i32, i32
  }
  func.func @transform_2(%arg0: i32, %arg1: i32) -> (i32, i32, i32) {
    %c0_i32 = arith.constant 0 : i32
    %c0_i32_0 = arith.constant 0 : i32
    return %arg0, %arg1, %c0_i32 : i32, i32, i32
  }
  func.func @transform_3(%arg0: i32, %arg1: i32) -> (i32, i32) {
    %c0_i32 = arith.constant 0 : i32
    %c0_i32_0 = arith.constant 0 : i32
    %c0_i32_1 = arith.constant 0 : i32
    return %c0_i32, %c0_i32_0 : i32, i32
  }
  func.func @transform_4(%arg0: i32, %arg1: i32) -> (i32, i32) {
    %c0_i32 = arith.constant 0 : i32
    %c0_i32_0 = arith.constant 0 : i32
    %c0_i32_1 = arith.constant 0 : i32
    return %c0_i32, %c0_i32_0 : i32, i32
  }
  func.func @transform_5(%arg0: i32, %arg1: i32) -> (i32, i32) {
    %c0_i32 = arith.constant 0 : i32
    %c0_i32_0 = arith.constant 0 : i32
    %c0_i32_1 = arith.constant 0 : i32
    return %c0_i32, %c0_i32_0 : i32, i32
  }
  func.func @transform_6(%arg0: i32, %arg1: i32) -> (i32, i32) {
    %c0_i32 = arith.constant 0 : i32
    %c0_i32_0 = arith.constant 0 : i32
    %c0_i32_1 = arith.constant 0 : i32
    return %c0_i32, %c0_i32_0 : i32, i32
  }
  func.func @transform_7(%arg0: i32, %arg1: i32) -> (i32, i32) {
    %c0_i32 = arith.constant 0 : i32
    %c0_i32_0 = arith.constant 0 : i32
    %c0_i32_1 = arith.constant 0 : i32
    return %c0_i32, %c0_i32_0 : i32, i32
  }
  func.func @transform_8(%arg0: i32, %arg1: i32) -> (i32, i32) {
    %c0_i32 = arith.constant 0 : i32
    %c0_i32_0 = arith.constant 0 : i32
    %c0_i32_1 = arith.constant 0 : i32
    return %c0_i32, %c0_i32_0 : i32, i32
  }
  func.func @transform_9(%arg0: i32, %arg1: i32) -> (i32, i32) {
    %c0_i32 = arith.constant 0 : i32
    %c0_i32_0 = arith.constant 0 : i32
    %c0_i32_1 = arith.constant 0 : i32
    return %c0_i32, %c0_i32_0 : i32, i32
  }
  func.func @transform_10(%arg0: i32, %arg1: i32) -> (i32, i32) {
    %c0_i32 = arith.constant 0 : i32
    %c0_i32_0 = arith.constant 0 : i32
    %c0_i32_1 = arith.constant 0 : i32
    return %c0_i32, %c0_i32_0 : i32, i32
  }
  func.func @transform_11(%arg0: i32, %arg1: i32) -> (i32, i32) {
    %c0_i32 = arith.constant 0 : i32
    %c0_i32_0 = arith.constant 0 : i32
    %c0_i32_1 = arith.constant 0 : i32
    return %c0_i32, %c0_i32_0 : i32, i32
  }
  func.func @transform_12(%arg0: i32, %arg1: i32) -> (i32, i32) {
    %c0_i32 = arith.constant 0 : i32
    %c0_i32_0 = arith.constant 0 : i32
    %c0_i32_1 = arith.constant 0 : i32
    return %c0_i32, %c0_i32_0 : i32, i32
  }
  func.func @transform_13(%arg0: i32, %arg1: i32) -> (i32, i32) {
    %c0_i32 = arith.constant 0 : i32
    %c0_i32_0 = arith.constant 0 : i32
    %c0_i32_1 = arith.constant 0 : i32
    return %c0_i32, %c0_i32_0 : i32, i32
  }
  func.func @transform_14(%arg0: i32, %arg1: i32) -> (i32, i32, i32) {
    %c0_i32 = arith.constant 0 : i32
    %c0_i32_0 = arith.constant 0 : i32
    return %arg0, %arg1, %c0_i32 : i32, i32, i32
  }
  func.func @transform_15(%arg0: i32, %arg1: i32) -> (i32, i32, i32) {
    %c0_i32 = arith.constant 0 : i32
    %c0_i32_0 = arith.constant 0 : i32
    return %arg0, %arg1, %c0_i32 : i32, i32, i32
  }
}

module attributes {stable_mosaic.version = 11 : i64} {
  func.func @kernel(%arg0: i32, %arg1: i32, %arg2: memref<1x8x64xf32, #tpu.memory_space<vmem>>, %arg3: memref<1x8x64xf32, #tpu.memory_space<vmem>>, %arg4: memref<1x64x3xbf16, #tpu.memory_space<vmem>>, %arg5: memref<3x64xbf16, #tpu.memory_space<vmem>>, %arg6: memref<64x64xbf16, #tpu.memory_space<vmem>>, %arg7: memref<1x64xf32, #tpu.memory_space<vmem>>, %arg8: memref<64x5xbf16, #tpu.memory_space<vmem>>, %arg9: memref<1x5xf32, #tpu.memory_space<vmem>>, %arg10: memref<64x6xf32, #tpu.memory_space<vmem>>, %arg11: memref<1x6xf32, #tpu.memory_space<vmem>>, %arg12: memref<1x5xf32, #tpu.memory_space<vmem>>, %arg13: memref<1x5xf32, #tpu.memory_space<vmem>>, %arg14: memref<1x6xf32, #tpu.memory_space<vmem>>, %arg15: memref<1x6xf32, #tpu.memory_space<vmem>>, %arg16: memref<1x8x6xf32, #tpu.memory_space<vmem>>, %arg17: memref<1x8x8x5xf32, #tpu.memory_space<vmem>>) attributes {dimension_semantics = [#tpu.dimension_semantics<parallel>, #tpu.dimension_semantics<parallel>], iteration_bounds = array<i64: 2, 1>, scalar_prefetch = 0 : i64, scratch_operands = 0 : i64, tpu.core_type = #tpu.core_type<tc>, window_params = [{transform_indices = @transform_0, window_bounds = array<i64: 1, 8, 64>}, {transform_indices = @transform_1, window_bounds = array<i64: 1, 8, 64>}, {transform_indices = @transform_2, window_bounds = array<i64: 1, 64, 3>}, {pipeline_mode = #tpu.pipeline_mode<synchronous>, transform_indices = @transform_3, window_bounds = array<i64: 3, 64>}, {pipeline_mode = #tpu.pipeline_mode<synchronous>, transform_indices = @transform_4, window_bounds = array<i64: 64, 64>}, {pipeline_mode = #tpu.pipeline_mode<synchronous>, transform_indices = @transform_5, window_bounds = array<i64: 1, 64>}, {pipeline_mode = #tpu.pipeline_mode<synchronous>, transform_indices = @transform_6, window_bounds = array<i64: 64, 5>}, {pipeline_mode = #tpu.pipeline_mode<synchronous>, transform_indices = @transform_7, window_bounds = array<i64: 1, 5>}, {pipeline_mode = #tpu.pipeline_mode<synchronous>, transform_indices = @transform_8, window_bounds = array<i64: 64, 6>}, {pipeline_mode = #tpu.pipeline_mode<synchronous>, transform_indices = @transform_9, window_bounds = array<i64: 1, 6>}, {pipeline_mode = #tpu.pipeline_mode<synchronous>, transform_indices = @transform_10, window_bounds = array<i64: 1, 5>}, {pipeline_mode = #tpu.pipeline_mode<synchronous>, transform_indices = @transform_11, window_bounds = array<i64: 1, 5>}, {pipeline_mode = #tpu.pipeline_mode<synchronous>, transform_indices = @transform_12, window_bounds = array<i64: 1, 6>}, {pipeline_mode = #tpu.pipeline_mode<synchronous>, transform_indices = @transform_13, window_bounds = array<i64: 1, 6>}, {transform_indices = @transform_14, window_bounds = array<i64: 1, 8, 6>}, {transform_indices = @transform_15, window_bounds = array<i64: 1, 8, 8, 5>}]} {
    %c0 = arith.constant 0 : index
    %c0_0 = arith.constant 0 : index
    %c0_1 = arith.constant 0 : index
    %0 = vector.load %arg4[%c0, %c0_0, %c0_1] : memref<1x64x3xbf16, #tpu.memory_space<vmem>>, vector<1x64x3xbf16>
    %1 = vector.shape_cast %0 : vector<1x64x3xbf16> to vector<64x3xbf16>
    %c0_2 = arith.constant 0 : index
    %c0_3 = arith.constant 0 : index
    %2 = vector.load %arg5[%c0_2, %c0_3] : memref<3x64xbf16, #tpu.memory_space<vmem>>, vector<3x64xbf16>
    %cst = arith.constant dense<0.000000e+00> : vector<64x64xf32>
    %3 = tpu.matmul %1, %2, %cst {dimension_numbers = #tpu.dot_dimension_numbers<[1], [0], [0], [1], [0, 0, 1, 1], [], []>} : vector<64x3xbf16>, vector<3x64xbf16>, vector<64x64xf32> -> vector<64x64xf32>
    %4 = vector.shape_cast %3 : vector<64x64xf32> to vector<8x8x64xf32>
    %c0_4 = arith.constant 0 : index
    %c0_5 = arith.constant 0 : index
    %c0_6 = arith.constant 0 : index
    %5 = vector.load %arg3[%c0_4, %c0_5, %c0_6] : memref<1x8x64xf32, #tpu.memory_space<vmem>>, vector<1x8x64xf32>
    %6 = vector.shape_cast %5 : vector<1x8x64xf32> to vector<8x64xf32>
    %7 = vector.shape_cast %6 : vector<8x64xf32> to vector<8x1x64xf32>
    %8 = vector.broadcast %7 : vector<8x1x64xf32> to vector<8x8x64xf32>
    %9 = arith.addf %4, %8 : vector<8x8x64xf32>
    %c0_7 = arith.constant 0 : index
    %c0_8 = arith.constant 0 : index
    %c0_9 = arith.constant 0 : index
    %10 = vector.load %arg2[%c0_7, %c0_8, %c0_9] : memref<1x8x64xf32, #tpu.memory_space<vmem>>, vector<1x8x64xf32>
    %11 = vector.shape_cast %10 : vector<1x8x64xf32> to vector<8x64xf32>
    %12 = vector.shape_cast %11 : vector<8x64xf32> to vector<1x8x64xf32>
    %13 = vector.broadcast %12 : vector<1x8x64xf32> to vector<8x8x64xf32>
    %14 = arith.addf %9, %13 : vector<8x8x64xf32>
    %cst_10 = arith.constant 0.000000e+00 : f32
    %15 = vector.broadcast %cst_10 : f32 to vector<8x8x64xf32>
    %16 = arith.maximumf %14, %15 : vector<8x8x64xf32>
    %17 = vector.shape_cast %16 : vector<8x8x64xf32> to vector<64x64xf32>
    %18 = arith.truncf %17 : vector<64x64xf32> to vector<64x64xbf16>
    %c0_11 = arith.constant 0 : index
    %c0_12 = arith.constant 0 : index
    %19 = vector.load %arg6[%c0_11, %c0_12] : memref<64x64xbf16, #tpu.memory_space<vmem>>, vector<64x64xbf16>
    %cst_13 = arith.constant dense<0.000000e+00> : vector<64x64xf32>
    %20 = tpu.matmul %18, %19, %cst_13 {dimension_numbers = #tpu.dot_dimension_numbers<[1], [0], [0], [1], [0, 0, 1, 1], [], []>} : vector<64x64xbf16>, vector<64x64xbf16>, vector<64x64xf32> -> vector<64x64xf32>
    %c0_14 = arith.constant 0 : index
    %c0_15 = arith.constant 0 : index
    %21 = vector.load %arg7[%c0_14, %c0_15] : memref<1x64xf32, #tpu.memory_space<vmem>>, vector<1x64xf32>
    %22 = vector.broadcast %21 : vector<1x64xf32> to vector<64x64xf32>
    %23 = arith.addf %20, %22 : vector<64x64xf32>
    %cst_16 = arith.constant 0.000000e+00 : f32
    %24 = vector.broadcast %cst_16 : f32 to vector<64x64xf32>
    %25 = arith.maximumf %23, %24 : vector<64x64xf32>
    %26 = arith.truncf %25 : vector<64x64xf32> to vector<64x64xbf16>
    %c0_17 = arith.constant 0 : index
    %c0_18 = arith.constant 0 : index
    %27 = vector.load %arg8[%c0_17, %c0_18] : memref<64x5xbf16, #tpu.memory_space<vmem>>, vector<64x5xbf16>
    %cst_19 = arith.constant dense<0.000000e+00> : vector<64x5xf32>
    %28 = tpu.matmul %26, %27, %cst_19 {dimension_numbers = #tpu.dot_dimension_numbers<[1], [0], [0], [1], [0, 0, 1, 1], [], []>} : vector<64x64xbf16>, vector<64x5xbf16>, vector<64x5xf32> -> vector<64x5xf32>
    %c0_20 = arith.constant 0 : index
    %c0_21 = arith.constant 0 : index
    %29 = vector.load %arg9[%c0_20, %c0_21] : memref<1x5xf32, #tpu.memory_space<vmem>>, vector<1x5xf32>
    %30 = vector.broadcast %29 : vector<1x5xf32> to vector<64x5xf32>
    %31 = arith.addf %28, %30 : vector<64x5xf32>
    %c0_22 = arith.constant 0 : index
    %c0_23 = arith.constant 0 : index
    %32 = vector.load %arg12[%c0_22, %c0_23] : memref<1x5xf32, #tpu.memory_space<vmem>>, vector<1x5xf32>
    %c0_24 = arith.constant 0 : index
    %c0_25 = arith.constant 0 : index
    %33 = vector.load %arg13[%c0_24, %c0_25] : memref<1x5xf32, #tpu.memory_space<vmem>>, vector<1x5xf32>
    %cst_26 = arith.constant dense<0.000000e+00> : vector<64xf32>
    %34 = vector.multi_reduction <add>, %31, %cst_26 [1] : vector<64x5xf32> to vector<64xf32>
    %35 = vector.shape_cast %34 : vector<64xf32> to vector<64x1xf32>
    %cst_27 = arith.constant 5.000000e+00 : f32
    %36 = vector.broadcast %cst_27 : f32 to vector<64x1xf32>
    %37 = arith.divf %35, %36 : vector<64x1xf32>
    %38 = vector.broadcast %37 : vector<64x1xf32> to vector<64x5xf32>
    %39 = arith.subf %31, %38 : vector<64x5xf32>
    %40 = arith.mulf %39, %39 : vector<64x5xf32>
    %cst_28 = arith.constant dense<0.000000e+00> : vector<64xf32>
    %41 = vector.multi_reduction <add>, %40, %cst_28 [1] : vector<64x5xf32> to vector<64xf32>
    %42 = vector.shape_cast %41 : vector<64xf32> to vector<64x1xf32>
    %cst_29 = arith.constant 5.000000e+00 : f32
    %43 = vector.broadcast %cst_29 : f32 to vector<64x1xf32>
    %44 = arith.divf %42, %43 : vector<64x1xf32>
    %45 = vector.broadcast %37 : vector<64x1xf32> to vector<64x5xf32>
    %46 = arith.subf %31, %45 : vector<64x5xf32>
    %cst_30 = arith.constant 9.99999974E-6 : f32
    %47 = vector.broadcast %cst_30 : f32 to vector<64x1xf32>
    %48 = arith.addf %44, %47 : vector<64x1xf32>
    %49 = math.rsqrt %48 : vector<64x1xf32>
    %50 = vector.broadcast %49 : vector<64x1xf32> to vector<64x5xf32>
    %51 = arith.mulf %46, %50 : vector<64x5xf32>
    %52 = vector.broadcast %32 : vector<1x5xf32> to vector<64x5xf32>
    %53 = arith.mulf %51, %52 : vector<64x5xf32>
    %54 = vector.broadcast %33 : vector<1x5xf32> to vector<64x5xf32>
    %55 = arith.addf %53, %54 : vector<64x5xf32>
    %56 = vector.shape_cast %55 : vector<64x5xf32> to vector<8x8x5xf32>
    %c0_31 = arith.constant 0 : index
    %c0_32 = arith.constant 0 : index
    %c0_33 = arith.constant 0 : index
    %c0_34 = arith.constant 0 : index
    %57 = vector.load %arg17[%c0_31, %c0_32, %c0_33, %c0_34] : memref<1x8x8x5xf32, #tpu.memory_space<vmem>>, vector<1x8x8x5xf32>
    %58 = vector.shape_cast %57 : vector<1x8x8x5xf32> to vector<8x8x5xf32>
    %59 = vector.shape_cast %56 : vector<8x8x5xf32> to vector<1x8x8x5xf32>
    tpu.vector_store %arg17[%c0_31, %c0_32, %c0_33, %c0_34], %59 {strides = array<i32>} : memref<1x8x8x5xf32, #tpu.memory_space<vmem>>, vector<1x8x8x5xf32>,
    %60 = vector.shape_cast %25 : vector<64x64xf32> to vector<8x8x64xf32>
    %cst_35 = arith.constant dense<0.000000e+00> : vector<8x64xf32>
    %61 = vector.multi_reduction <add>, %60, %cst_35 [1] : vector<8x8x64xf32> to vector<8x64xf32>
    %c0_36 = arith.constant 0 : index
    %c0_37 = arith.constant 0 : index
    %62 = vector.load %arg10[%c0_36, %c0_37] : memref<64x6xf32, #tpu.memory_space<vmem>>, vector<64x6xf32>
    %cst_38 = arith.constant dense<0.000000e+00> : vector<8x6xf32>
    %63 = tpu.matmul %61, %62, %cst_38 {dimension_numbers = #tpu.dot_dimension_numbers<[1], [0], [0], [1], [0, 0, 1, 1], [], []>} : vector<8x64xf32>, vector<64x6xf32>, vector<8x6xf32> -> vector<8x6xf32>
    %c0_39 = arith.constant 0 : index
    %c0_40 = arith.constant 0 : index
    %64 = vector.load %arg11[%c0_39, %c0_40] : memref<1x6xf32, #tpu.memory_space<vmem>>, vector<1x6xf32>
    %cst_41 = arith.constant 8.000000e+00 : f32
    %65 = vector.broadcast %cst_41 : f32 to vector<1x6xf32>
    %66 = arith.mulf %65, %64 : vector<1x6xf32>
    %67 = vector.broadcast %66 : vector<1x6xf32> to vector<8x6xf32>
    %68 = arith.addf %63, %67 : vector<8x6xf32>
    %c0_42 = arith.constant 0 : index
    %c0_43 = arith.constant 0 : index
    %69 = vector.load %arg14[%c0_42, %c0_43] : memref<1x6xf32, #tpu.memory_space<vmem>>, vector<1x6xf32>
    %c0_44 = arith.constant 0 : index
    %c0_45 = arith.constant 0 : index
    %70 = vector.load %arg15[%c0_44, %c0_45] : memref<1x6xf32, #tpu.memory_space<vmem>>, vector<1x6xf32>
    %cst_46 = arith.constant dense<0.000000e+00> : vector<8xf32>
    %71 = vector.multi_reduction <add>, %68, %cst_46 [1] : vector<8x6xf32> to vector<8xf32>
    %72 = vector.shape_cast %71 : vector<8xf32> to vector<8x1xf32>
    %cst_47 = arith.constant 6.000000e+00 : f32
    %73 = vector.broadcast %cst_47 : f32 to vector<8x1xf32>
    %74 = arith.divf %72, %73 : vector<8x1xf32>
    %75 = vector.broadcast %74 : vector<8x1xf32> to vector<8x6xf32>
    %76 = arith.subf %68, %75 : vector<8x6xf32>
    %77 = arith.mulf %76, %76 : vector<8x6xf32>
    %cst_48 = arith.constant dense<0.000000e+00> : vector<8xf32>
    %78 = vector.multi_reduction <add>, %77, %cst_48 [1] : vector<8x6xf32> to vector<8xf32>
    %79 = vector.shape_cast %78 : vector<8xf32> to vector<8x1xf32>
    %cst_49 = arith.constant 6.000000e+00 : f32
    %80 = vector.broadcast %cst_49 : f32 to vector<8x1xf32>
    %81 = arith.divf %79, %80 : vector<8x1xf32>
    %82 = vector.broadcast %74 : vector<8x1xf32> to vector<8x6xf32>
    %83 = arith.subf %68, %82 : vector<8x6xf32>
    %cst_50 = arith.constant 9.99999974E-6 : f32
    %84 = vector.broadcast %cst_50 : f32 to vector<8x1xf32>
    %85 = arith.addf %81, %84 : vector<8x1xf32>
    %86 = math.rsqrt %85 : vector<8x1xf32>
    %87 = vector.broadcast %86 : vector<8x1xf32> to vector<8x6xf32>
    %88 = arith.mulf %83, %87 : vector<8x6xf32>
    %89 = vector.broadcast %69 : vector<1x6xf32> to vector<8x6xf32>
    %90 = arith.mulf %88, %89 : vector<8x6xf32>
    %91 = vector.broadcast %70 : vector<1x6xf32> to vector<8x6xf32>
    %92 = arith.addf %90, %91 : vector<8x6xf32>
    %c0_51 = arith.constant 0 : index
    %c0_52 = arith.constant 0 : index
    %c0_53 = arith.constant 0 : index
    %93 = vector.load %arg16[%c0_51, %c0_52, %c0_53] : memref<1x8x6xf32, #tpu.memory_space<vmem>>, vector<1x8x6xf32>
    %94 = vector.shape_cast %93 : vector<1x8x6xf32> to vector<8x6xf32>
    %95 = vector.shape_cast %92 : vector<8x6xf32> to vector<1x8x6xf32>
    tpu.vector_store %arg16[%c0_51, %c0_52, %c0_53], %95 {strides = array<i32>} : memref<1x8x6xf32, #tpu.memory_space<vmem>>, vector<1x8x6xf32>,
    return
  }
  func.func @transform_0(%arg0: i32, %arg1: i32) -> (i32, i32, i32) {
    %c0_i32 = arith.constant 0 : i32
    %c0_i32_0 = arith.constant 0 : i32
    %c0_i32_1 = arith.constant 0 : i32
    return %arg0, %c0_i32, %c0_i32_0 : i32, i32, i32
  }
  func.func @transform_1(%arg0: i32, %arg1: i32) -> (i32, i32, i32) {
    %c0_i32 = arith.constant 0 : i32
    %c0_i32_0 = arith.constant 0 : i32
    return %arg0, %arg1, %c0_i32 : i32, i32, i32
  }
  func.func @transform_2(%arg0: i32, %arg1: i32) -> (i32, i32, i32) {
    %c0_i32 = arith.constant 0 : i32
    %c0_i32_0 = arith.constant 0 : i32
    return %arg0, %arg1, %c0_i32 : i32, i32, i32
  }
  func.func @transform_3(%arg0: i32, %arg1: i32) -> (i32, i32) {
    %c0_i32 = arith.constant 0 : i32
    %c0_i32_0 = arith.constant 0 : i32
    %c0_i32_1 = arith.constant 0 : i32
    return %c0_i32, %c0_i32_0 : i32, i32
  }
  func.func @transform_4(%arg0: i32, %arg1: i32) -> (i32, i32) {
    %c0_i32 = arith.constant 0 : i32
    %c0_i32_0 = arith.constant 0 : i32
    %c0_i32_1 = arith.constant 0 : i32
    return %c0_i32, %c0_i32_0 : i32, i32
  }
  func.func @transform_5(%arg0: i32, %arg1: i32) -> (i32, i32) {
    %c0_i32 = arith.constant 0 : i32
    %c0_i32_0 = arith.constant 0 : i32
    %c0_i32_1 = arith.constant 0 : i32
    return %c0_i32, %c0_i32_0 : i32, i32
  }
  func.func @transform_6(%arg0: i32, %arg1: i32) -> (i32, i32) {
    %c0_i32 = arith.constant 0 : i32
    %c0_i32_0 = arith.constant 0 : i32
    %c0_i32_1 = arith.constant 0 : i32
    return %c0_i32, %c0_i32_0 : i32, i32
  }
  func.func @transform_7(%arg0: i32, %arg1: i32) -> (i32, i32) {
    %c0_i32 = arith.constant 0 : i32
    %c0_i32_0 = arith.constant 0 : i32
    %c0_i32_1 = arith.constant 0 : i32
    return %c0_i32, %c0_i32_0 : i32, i32
  }
  func.func @transform_8(%arg0: i32, %arg1: i32) -> (i32, i32) {
    %c0_i32 = arith.constant 0 : i32
    %c0_i32_0 = arith.constant 0 : i32
    %c0_i32_1 = arith.constant 0 : i32
    return %c0_i32, %c0_i32_0 : i32, i32
  }
  func.func @transform_9(%arg0: i32, %arg1: i32) -> (i32, i32) {
    %c0_i32 = arith.constant 0 : i32
    %c0_i32_0 = arith.constant 0 : i32
    %c0_i32_1 = arith.constant 0 : i32
    return %c0_i32, %c0_i32_0 : i32, i32
  }
  func.func @transform_10(%arg0: i32, %arg1: i32) -> (i32, i32) {
    %c0_i32 = arith.constant 0 : i32
    %c0_i32_0 = arith.constant 0 : i32
    %c0_i32_1 = arith.constant 0 : i32
    return %c0_i32, %c0_i32_0 : i32, i32
  }
  func.func @transform_11(%arg0: i32, %arg1: i32) -> (i32, i32) {
    %c0_i32 = arith.constant 0 : i32
    %c0_i32_0 = arith.constant 0 : i32
    %c0_i32_1 = arith.constant 0 : i32
    return %c0_i32, %c0_i32_0 : i32, i32
  }
  func.func @transform_12(%arg0: i32, %arg1: i32) -> (i32, i32) {
    %c0_i32 = arith.constant 0 : i32
    %c0_i32_0 = arith.constant 0 : i32
    %c0_i32_1 = arith.constant 0 : i32
    return %c0_i32, %c0_i32_0 : i32, i32
  }
  func.func @transform_13(%arg0: i32, %arg1: i32) -> (i32, i32) {
    %c0_i32 = arith.constant 0 : i32
    %c0_i32_0 = arith.constant 0 : i32
    %c0_i32_1 = arith.constant 0 : i32
    return %c0_i32, %c0_i32_0 : i32, i32
  }
  func.func @transform_14(%arg0: i32, %arg1: i32) -> (i32, i32, i32) {
    %c0_i32 = arith.constant 0 : i32
    %c0_i32_0 = arith.constant 0 : i32
    return %arg0, %arg1, %c0_i32 : i32, i32, i32
  }
  func.func @transform_15(%arg0: i32, %arg1: i32) -> (i32, i32, i32, i32) {
    %c0_i32 = arith.constant 0 : i32
    %c0_i32_0 = arith.constant 0 : i32
    %c0_i32_1 = arith.constant 0 : i32
    return %arg0, %arg1, %c0_i32, %c0_i32_0 : i32, i32, i32, i32
  }
}

</mosaic_0001>

<bundles_post_ra>
// kernel: tpu_custom_call.1
= control target key start
LH: loop header
LB: loop body
LE: loop exit
PB: predicated region body
PF: predicated region fallthrough
CT: control target
= control target key end

     0   :  { %s1682_s18 = smov 0   ;;  %s1684_s19 = smov 0   ;;  %s1969_s0 = inlined_call_operand.vmem [shape: f32[2,8,64], index: 0, kind: input, shape index: {}]   ;;  %s1970_s1 = inlined_call_operand.vmem [shape: f32[2,8,64], index: 1, kind: input, shape index: {}]   ;;  %s1971_s2 = inlined_call_operand.vmem [shape: bf16[2,64,3], index: 2, kind: input, shape index: {}]   ;;  %s1972_s3 = inlined_call_operand.vmem [shape: bf16[3,64], index: 3, kind: input, shape index: {}]   ;;  %s1973_s4 = inlined_call_operand.vmem [shape: bf16[64,64], index: 4, kind: input, shape index: {}]   ;;  %s1974_s5 = inlined_call_operand.vmem [shape: f32[1,64], index: 5, kind: input, shape index: {}]   ;;  %s1975_s6 = inlined_call_operand.vmem [shape: bf16[64,5], index: 6, kind: input, shape index: {}]   ;;  %s1976_s7 = inlined_call_operand.vmem [shape: f32[1,5], index: 7, kind: input, shape index: {}]   ;;  %s1977_s8 = inlined_call_operand.vmem [shape: f32[64,6], index: 8, kind: input, shape index: {}]   ;;  %s1978_s9 = inlined_call_operand.vmem [shape: f32[1,6], index: 9, kind: input, shape index: {}]   ;;  %s1979_s10 = inlined_call_operand.vmem [shape: f32[1,5], index: 10, kind: input, shape index: {}]   ;;  %s1980_s11 = inlined_call_operand.vmem [shape: f32[1,5], index: 11, kind: input, shape index: {}]   ;;  %s1981_s12 = inlined_call_operand.vmem [shape: f32[1,6], index: 12, kind: input, shape index: {}]   ;;  %s1982_s13 = inlined_call_operand.vmem [shape: f32[1,6], index: 13, kind: input, shape index: {}]   ;;  %s1983_s14 = inlined_call_operand.vmem [shape: f32[2,8,6], index: 14, kind: output, shape index: {0}]   ;;  %s1984_s15 = inlined_call_operand.vmem [shape: f32[2,8,8,5], index: 15, kind: output, shape index: {1}]  }
   0x1   :  { %s1686_s20 = smov 0  }
   0x2 LB: > { %s38_s21 = sadd.s32 1, %s1593_s19  ;;  %p1427_p0 = scmp.ge.s32.totalorder %s1597_s20, 1  ;;  %s1597_s20 = sphi %s1686_s20, %s26_s20   ;;  %s1593_s19 = sphi %s1684_s19, %s1986_s19   ;;  %s1589_s18 = sphi %s1682_s18, %s1985_s18  }
   0x3   : > { %p40_p1 = scmp.ge.s32.totalorder %s38_s21, 2  ;;  %p486_p2 = scmp.lt.s32.totalorder %s1597_s20, 3 }
   0x5   : > { %s1988_s21 = smov (%p40_p1, %s38_s21), 0  ;;  %p487_p3 = pnand %p1427_p0, %p486_p2 }
   0x6   : > { %p560_p4 = scmp.lt.s32.totalorder (!%p487_p3), %s1589_s18, 1 }
   0x7   : > { %490 = sbr.rel (%p487_p3) target bundleno = 775 (0x307), region = 76 }
   0xc   : > { %v607_v0 = vld [vmem:[%s1972_s3] sm:$0x3]  ;;  %vm641_vm0 = vcmask 1040384   ;;  %vm642_vm1 = vcmask 1041408   ;;  %v1599_v1 = vmov 65535   ;;  %s1990_s18 = smov (!%p560_p4, %s1589_s18), 1 }
   0xd   : > { %v643_v2 = vsel %vm641_vm0, 4294967295, %v1599_v1  ;;  %s1498_s24 = sshll.u32 %s1990_s18, 5  ;;  %vm628_vm2 = vcmask 23552   ;;  %v1507_v9 = vld [vmem:[%s1973_s4 + $0x18] sm:$0xff]  ;;  %v1506_v10 = vld [vmem:[%s1973_s4 + $0x10] sm:$0xff]  ;;  %v1505_v11 = vld [vmem:[%s1973_s4 + $0x8] sm:$0xff] }
   0xe   : > { %v644_v3 = vsel %vm642_vm1, %v643_v2, 0  ;;  %s579_s27 = scalar_lea.vmem %s1971_s2, %s1498_s24  ;;  %784 = vmatpush.bf16.msra.mxu1 %v1507_v9  ;;  %1512 = vmatpush.bf16.msra.mxu3 %v1507_v9  ;;  %v1504_v12 = vld [vmem:[%s1973_s4] sm:$0xff]  ;;  %s1722_s25 = sshll.u32 %s1990_s18, 3  ;;  %vm767_vm3 = vcmask 523264   ;;  %v1511_v2 = vld [vmem:[%s1975_s6 + $0x18] sm:$0xff]  ;;  %vm1191_vm4 = vcmask 1041409  }
   0xf   : > { %v646_v4 = vand.u32 %v644_v3, %v607_v0  ;;  %v1500_v5 = vld [vmem:[%s579_s27] sm:$0xff]  ;;  %v1501_v6 = vld [vmem:[%s579_s27 + $0x8] sm:$0xff]  ;;  %v1502_v7 = vld [vmem:[%s579_s27 + $0x10] sm:$0xff]  ;;  %s570_s28 = scalar_lea.vmem %s1970_s1, %s1722_s25  ;;  %s563_s16 = scalar_lea.vmem %s1969_s0, %s1722_s25  ;;  %873 = vmatpush.bf16.msra.mxu2 %v1511_v2  ;;  %vm1193_vm5 = vcmask 1042434   ;;  %vm1195_vm6 = vcmask 1043459   ;;  %vm1197_vm7 = vcmask 1044484  }
  0x10   : > { %v1503_v8 = vld [vmem:[%s579_s27 + $0x18] sm:$0xff]  ;;  %v677_v13 = vld [vmem:[%s570_s28] sm:$0xff]  ;;  %v1510_v3 = vld [vmem:[%s1975_s6 + $0x10] sm:$0xff]  ;;  %vm1199_vm8 = vcmask 1045509   ;;  %vm1201_vm9 = vcmask 1046534   ;;  %vm1203_vm10 = vcmask 1047559   ;;  %s587_s24 = scalar_lea.vmem %s1983_s14, %s1722_s25 }
  0x11   : > { %655 = vmatpush.bf16.msra.mxu0 %v646_v4  ;;  %v686_v15 = vperm.slane %v677_v13, 0  ;;  %v679_v16 = vrot.slane %v677_v13, 1  ;;  %v710_v19 = vld [vmem:[%s563_s16] sm:$0xff]  ;;  %v680_v26 = vrot.slane %v677_v13, 2  ;;  %v681_v30 = vrot.slane %v677_v13, 3  ;;  %v1509_v4 = vld [vmem:[%s1975_s6 + $0x8] sm:$0xff] }
  0x12   : > { %785 = vmatpush.bf16.msra.mxu1 %v1506_v10  ;;  %1513 = vmatpush.bf16.msra.mxu3 %v1506_v10  ;;  %v682_v39 = vrot.slane %v677_v13, 4  ;;  %v683_v43 = vrot.slane %v677_v13, 5  ;;  %v684_v52 = vrot.slane %v677_v13, 6  ;;  %v685_v56 = vrot.slane %v677_v13, 7  ;;  %s1499_s23 = sshll.u32 %s1990_s18, 6 }
  0x13   : > { %v687_v18 = vperm.slane %v679_v16, 0  ;;  %v688_v29 = vperm.slane %v680_v26, 0  ;;  %v689_v32 = vperm.slane %v681_v30, 0  ;;  %874 = vmatpush.bf16.msra.mxu2 %v1510_v3  ;;  %v1174_v30 = vld [vmem:[%s1977_s8 + $0x20] sm:$0xff]  ;;  %vm900_vm11 = vcmask 39936   ;;  %s1903_s29 = scalar_lea.vmem %s1984_s15, %s1499_s23 }
  0x14   : > { %1451 = vmatmul.msk.bf16.vlgmr.msra.gmra.mxu0 %vm628_vm2, %v1500_v5  ;;  %v690_v42 = vperm.slane %v682_v39, 0  ;;  %v691_v45 = vperm.slane %v683_v43, 0  ;;  %v692_v55 = vperm.slane %v684_v52, 0  ;;  %v693_v58 = vperm.slane %v685_v56, 0  ;;  %v1508_v5 = vld [vmem:[%s1975_s6] sm:$0xff] }
  0x15   : > { %vm1229_vm12 = vcmask 48128  }
  0x16   : > { %786 = vmatpush.bf16.msra.mxu1 %v1505_v11  ;;  %1514 = vmatpush.bf16.msra.mxu3 %v1505_v11 }
  0x17   : > { %875 = vmatpush.bf16.msra.mxu2 %v1509_v4 }
  0x1a   : > { %787 = vmatpush.bf16.msra.mxu1 %v1504_v12  ;;  %1515 = vmatpush.bf16.msra.mxu3 %v1504_v12 }
  0x1b   : > { %876 = vmatpush.bf16.msra.mxu2 %v1508_v5 }
  0x1e   : > { %1516 = vmatpush.bf16.msrb.mxu3 %v1511_v2 }
  0x22   : > { %1517 = vmatpush.bf16.msrb.mxu3 %v1510_v3 }
  0x24   : > { %1452 = vmatmul.msk.bf16.gmra.mxu0 %vm628_vm2, %v1501_v6 }
  0x26   : > { %1518 = vmatpush.bf16.msrb.mxu3 %v1509_v4 }
  0x2a   : > { %1519 = vmatpush.bf16.msrb.mxu3 %v1508_v5 }
  0x34   : > { %1453 = vmatmul.msk.bf16.gmra.mxu0 %vm628_vm2, %v1502_v7  ;;  %v1751_v7 = vld [vmem:[%s1974_s5] ss:$0 sm:$0xff] }
  0x44   : > { %1454 = vmatmul.msk.bf16.gmra.mxu0 %vm628_vm2, %v1503_v8 }
  0x91   : > { %v657_v14 = vpop.f32.mrf.mxu0 }
  0x92   : > { %v702_v17 = vadd.f32 %v686_v15, %v657_v14 }
  0x94   : > { %v711_v21 = vadd.f32 %v710_v19, %v702_v17 }
  0x96   : > { %v719_v24 = vmax.f32 %v711_v21, 0.0 }
  0x99   : > { %v659_v20 = vpop.f32.mrf.mxu0 }
  0x9a   : > { %v703_v22 = vadd.f32 %v687_v18, %v659_v20 }
  0x9c   : > { %v712_v23 = vadd.f32 %v710_v19, %v703_v22  ;;  %v1177_v22 = vld [vmem:[%s1977_s8 + $0x38] sm:$0xff] }
  0x9e   : > { %v720_v25 = vmax.f32 %v712_v23, 0.0 }
  0xa0   : > { %v727_v27 = vpack.c.bf16 %v720_v25, %v719_v24  ;;  %v1176_v24 = vld [vmem:[%s1977_s8 + $0x30] sm:$0xff] }
  0xa1   : > { %v662_v28 = vpop.f32.mrf.mxu0 }
  0xa2   : > { %1471 = vmatmul.msk.bf16.vlgmr.msra.gmra.mxu1 %vm767_vm3, %v727_v27  ;;  %v704_v31 = vadd.f32 %v688_v29, %v662_v28  ;;  %v1175_v27 = vld [vmem:[%s1977_s8 + $0x28] sm:$0xff] }
  0xa4   : > { %v713_v34 = vadd.f32 %v710_v19, %v704_v31 }
  0xa6   : > { %v721_v37 = vmax.f32 %v713_v34, 0.0  ;;  %v1171_v34 = vld [vmem:[%s1977_s8 + $0x8] sm:$0xff] }
  0xa9   : > { %v664_v33 = vpop.f32.mrf.mxu0 }
  0xaa   : > { %v705_v35 = vadd.f32 %v689_v32, %v664_v33  ;;  %v1173_v32 = vld [vmem:[%s1977_s8 + $0x18] sm:$0xff]  ;;  %v1172_v33 = vld [vmem:[%s1977_s8 + $0x10] sm:$0xff] }
  0xac   : > { %v714_v36 = vadd.f32 %v710_v19, %v705_v35  ;;  %v1170_v35 = vld [vmem:[%s1977_s8] sm:$0xff] }
  0xae   : > { %v722_v38 = vmax.f32 %v714_v36, 0.0 }
  0xb0   : > { %v728_v40 = vpack.c.bf16 %v722_v38, %v721_v37 }
  0xb1   : > { %v667_v41 = vpop.f32.mrf.mxu0 }
  0xb2   : > { %1472 = vmatmul.msk.bf16.gmra.mxu1 %vm767_vm3, %v728_v40  ;;  %v706_v44 = vadd.f32 %v690_v42, %v667_v41 }
  0xb4   : > { %v715_v47 = vadd.f32 %v710_v19, %v706_v44 }
  0xb6   : > { %v723_v50 = vmax.f32 %v715_v47, 0.0 }
  0xb9   : > { %v669_v46 = vpop.f32.mrf.mxu0 }
  0xba   : > { %v707_v48 = vadd.f32 %v691_v45, %v669_v46 }
  0xbc   : > { %v716_v49 = vadd.f32 %v710_v19, %v707_v48 }
  0xbe   : > { %v724_v51 = vmax.f32 %v716_v49, 0.0 }
  0xc0   : > { %v729_v53 = vpack.c.bf16 %v724_v51, %v723_v50 }
  0xc1   : > { %v672_v54 = vpop.f32.mrf.mxu0 }
  0xc2   : > { %1473 = vmatmul.msk.bf16.gmra.mxu1 %vm767_vm3, %v729_v53  ;;  %v708_v57 = vadd.f32 %v692_v55, %v672_v54 }
  0xc4   : > { %v717_v60 = vadd.f32 %v710_v19, %v708_v57 }
  0xc6   : > { %v725_v63 = vmax.f32 %v717_v60, 0.0 }
  0xc9   : > { %v674_v59 = vpop.f32.mrf.mxu0 }
  0xca   : > { %v709_v61 = vadd.f32 %v693_v58, %v674_v59 }
  0xcc   : > { %v718_v62 = vadd.f32 %v710_v19, %v709_v61 }
  0xce   : > { %v726_v0 = vmax.f32 %v718_v62, 0.0 }
  0xd0   : > { %v730_v1 = vpack.c.bf16 %v726_v0, %v725_v63 }
  0xd2   : > { %1474 = vmatmul.msk.bf16.vlgmr.msra.gmra.mxu3 %vm767_vm3, %v730_v1 }
  0xd3   : > { %1215 = vmatpush.msra.mxu3 %v1177_v22 }
  0xd5   : > { %1216 = vmatpush.msra.mxu3 %v1176_v24 }
  0xd7   : > { %1217 = vmatpush.msra.mxu3 %v1175_v27 }
  0xd9   : > { %1218 = vmatpush.msra.mxu3 %v1174_v30 }
  0xdb   : > { %1219 = vmatpush.msra.mxu3 %v1173_v32 }
  0xdd   : > { %1220 = vmatpush.msra.mxu3 %v1172_v33 }
  0xdf   : > { %1221 = vmatpush.msra.mxu3 %v1171_v34 }
  0xe1   : > { %1222 = vmatpush.msra.mxu3 %v1170_v35 }
 0x11f   : > { %v789_v6 = vpop.f32.mrf.mxu1 }
 0x120   : > { %v790_v8 = vadd.f32 %v1751_v7, %v789_v6 }
 0x122   : > { %v809_v11 = vmax.f32 %v790_v8, 0.0 }
 0x124   : > { %v1114_v38 = vsel %vm767_vm3, %v809_v11, 0.0 }
 0x125   : > { %v1115_v46 = vrot.slane %v1114_v38, 4 }
 0x127   : > { %v791_v9 = vpop.f32.mrf.mxu1  ;;  %v1116_v54 = vadd.f32 %v1115_v46, %v1114_v38 }
 0x128   : > { %v792_v10 = vadd.f32 %v1751_v7, %v791_v9 }
 0x129   : > { %v1117_v0 = vrot.slane %v1116_v54, 2 }
 0x12a   : > { %v810_v12 = vmax.f32 %v792_v10, 0.0 }
 0x12c   : > { %v817_v13 = vpack.c.bf16 %v810_v12, %v809_v11  ;;  %v1121_v36 = vsel %vm767_vm3, %v810_v12, 0.0  ;;  %v1118_v11 = vadd.f32 %v1117_v0, %v1116_v54  ;;  %v1178_v0 = vld [vmem:[%s1978_s9] sm:$0x1] }
 0x12d   : > { %v1122_v40 = vrot.slane %v1121_v36, 4 }
 0x12e   : > { %1491 = vmatmul.msk.bf16.vlgmr.msra.gmra.mxu2 %vm767_vm3, %v817_v13 }
 0x12f   : > { %v794_v14 = vpop.f32.mrf.mxu1  ;;  %v1123_v50 = vadd.f32 %v1122_v40, %v1121_v36 }
 0x130   : > { %v795_v15 = vadd.f32 %v1751_v7, %v794_v14 }
 0x131   : > { %v1124_v58 = vrot.slane %v1123_v50, 2 }
 0x132   : > { %v811_v18 = vmax.f32 %v795_v15, 0.0 }
 0x133   : > { %v1125_v4 = vadd.f32 %v1124_v58, %v1123_v50 }
 0x134   : > { %v1128_v37 = vsel %vm767_vm3, %v811_v18, 0.0 }
 0x135   : > { %v1129_v43 = vrot.slane %v1128_v37, 4  ;;  %v1126_v15 = vrot.slane %v1125_v4, 1 }
 0x137   : > { %v796_v16 = vpop.f32.mrf.mxu1  ;;  %v1130_v52 = vadd.f32 %v1129_v43, %v1128_v37 }
 0x138   : > { %v797_v17 = vadd.f32 %v1751_v7, %v796_v16 }
 0x139   : > { %v1131_v61 = vrot.slane %v1130_v52, 2 }
 0x13a   : > { %v812_v19 = vmax.f32 %v797_v17, 0.0 }
 0x13b   : > { %v1132_v6 = vadd.f32 %v1131_v61, %v1130_v52 }
 0x13c   : > { %v818_v20 = vpack.c.bf16 %v812_v19, %v811_v18  ;;  %v1135_v39 = vsel %vm767_vm3, %v812_v19, 0.0  ;;  %v1119_v19 = vrot.slane %v1118_v11, 1 }
 0x13d   : > { %v1136_v47 = vrot.slane %v1135_v39, 4  ;;  %v1133_v17 = vrot.slane %v1132_v6, 1 }
 0x13e   : > { %1492 = vmatmul.msk.bf16.gmra.mxu2 %vm767_vm3, %v818_v20 }
 0x13f   : > { %v799_v21 = vpop.f32.mrf.mxu1  ;;  %v1137_v55 = vadd.f32 %v1136_v47, %v1135_v39 }
 0x140   : > { %v800_v23 = vadd.f32 %v1751_v7, %v799_v21 }
 0x141   : > { %v1138_v1 = vrot.slane %v1137_v55, 2 }
 0x142   : > { %v813_v28 = vmax.f32 %v800_v23, 0.0  ;;  %v1127_v23 = vadd.f32 %v1126_v15, %v1125_v4 }
 0x143   : > { %v1139_v12 = vadd.f32 %v1138_v1, %v1137_v55 }
 0x144   : > { %v1142_v41 = vsel %vm767_vm3, %v813_v28, 0.0 }
 0x145   : > { %v1143_v48 = vrot.slane %v1142_v41, 4  ;;  %v1140_v20 = vrot.slane %v1139_v12, 1 }
 0x147   : > { %v801_v25 = vpop.f32.mrf.mxu1  ;;  %v1144_v57 = vadd.f32 %v1143_v48, %v1142_v41 }
 0x148   : > { %v802_v26 = vadd.f32 %v1751_v7, %v801_v25 }
 0x149   : > { %v1145_v2 = vrot.slane %v1144_v57, 2 }
 0x14a   : > { %v814_v29 = vmax.f32 %v802_v26, 0.0  ;;  %v1134_v26 = vadd.f32 %v1133_v17, %v1132_v6 }
 0x14b   : > { %v1146_v14 = vadd.f32 %v1145_v2, %v1144_v57 }
 0x14c   : > { %v819_v31 = vpack.c.bf16 %v814_v29, %v813_v28  ;;  %v1149_v44 = vsel %vm767_vm3, %v814_v29, 0.0  ;;  %v1120_v28 = vadd.f32 %v1119_v19, %v1118_v11  ;;  %v1141_v29 = vadd.f32 %v1140_v20, %v1139_v12 }
 0x14d   : > { %v1150_v51 = vrot.slane %v1149_v44, 4  ;;  %v1147_v22 = vrot.slane %v1146_v14, 1 }
 0x14e   : > { %1493 = vmatmul.msk.bf16.gmra.mxu2 %vm767_vm3, %v819_v31  ;;  %v1192_v32 = vsel %vm1191_vm4, %v1127_v23, %v1120_v28 }
 0x14f   : > { %v1151_v59 = vadd.f32 %v1150_v51, %v1149_v44  ;;  %v1148_v31 = vadd.f32 %v1147_v22, %v1146_v14  ;;  %v1194_v34 = vsel %vm1193_vm5, %v1134_v26, %v1192_v32 }
 0x150   : > { %v1196_v36 = vsel %vm1195_vm6, %v1141_v29, %v1194_v34 }
 0x151   : > { %v1152_v5 = vrot.slane %v1151_v59, 2  ;;  %v1198_v38 = vsel %vm1197_vm7, %v1148_v31, %v1196_v36 }
 0x153   : > { %v1153_v16 = vadd.f32 %v1152_v5, %v1151_v59 }
 0x155   : > { %v804_v42 = vpop.f32.mrf.mxu3  ;;  %v1154_v24 = vrot.slane %v1153_v16, 1 }
 0x156   : > { %v805_v45 = vadd.f32 %v1751_v7, %v804_v42  ;;  %v1548_v42 = vld [vmem:[%s1976_s7] ss:$0 sm:$0xff] }
 0x157   : > { %v1155_v33 = vadd.f32 %v1154_v24, %v1153_v16 }
 0x158   : > { %v815_v49 = vmax.f32 %v805_v45, 0.0 }
 0x159   : > { %v1200_v39 = vsel %vm1199_vm8, %v1155_v33, %v1198_v38 }
 0x15a   : > { %v1156_v53 = vsel %vm767_vm3, %v815_v49, 0.0 }
 0x15b   : > { %v1157_v56 = vrot.slane %v1156_v53, 4 }
 0x15d   : > { %v806_v60 = vpop.f32.mrf.mxu3  ;;  %v1158_v62 = vadd.f32 %v1157_v56, %v1156_v53 }
 0x15e   : > { %v807_v63 = vadd.f32 %v1751_v7, %v806_v60 }
 0x15f   : > { %v1159_v8 = vrot.slane %v1158_v62, 2 }
 0x160   : > { %v816_v3 = vmax.f32 %v807_v63, 0.0 }
 0x161   : > { %v1160_v18 = vadd.f32 %v1159_v8, %v1158_v62 }
 0x162   : > { %v820_v9 = vpack.c.bf16 %v816_v3, %v815_v49  ;;  %v1163_v10 = vsel %vm767_vm3, %v816_v3, 0.0  ;;  %v1179_v3 = vmul.f32 8.0, %v1178_v0 }
 0x163   : > { %v1164_v13 = vrot.slane %v1163_v10, 4  ;;  %v1161_v27 = vrot.slane %v1160_v18, 1 }
 0x164   : > { %1494 = vmatmul.msk.bf16.vlgmr.msrb.gmra.mxu3 %vm767_vm3, %v820_v9  ;;  %v1181_v5 = vperm.slane %v1179_v3, 0 }
 0x165   : > { %v1165_v7 = vadd.f32 %v1164_v13, %v1163_v10  ;;  %v1162_v35 = vadd.f32 %v1161_v27, %v1160_v18  ;;  %v1600_v10 = vmov 5.0  }
 0x166   : > { %1553 = vrcp.f32 %v1600_v10 }
 0x167   : > { %v1166_v21 = vrot.slane %v1165_v7, 2  ;;  %v1202_v40 = vsel %vm1201_vm9, %v1162_v35, %v1200_v39 }
 0x169   : > { %v1167_v25 = vadd.f32 %v1166_v21, %v1165_v7 }
 0x16b   : > { %v1168_v30 = vrot.slane %v1167_v25, 1 }
 0x16c   : > { %v1554_v11 = vpop.eup %1553 }
 0x16d   : > { %v1169_v37 = vadd.f32 %v1168_v30, %v1167_v25  ;;  %v926_v12 = vmul.f32 5.0, %v1554_v11  ;;  %vm930_vm13 = vweird.f32 %v1554_v11 }
 0x16f   : > { %v1204_v41 = vsel %vm1203_vm10, %v1169_v37, %v1202_v40  ;;  %v927_v13 = vsub.f32 1.0, %v926_v12 }
 0x171   : > { %v928_v14 = vmul.f32 %v1554_v11, %v927_v13 }
 0x173   : > { %v929_v15 = vadd.f32 %v1554_v11, %v928_v14 }
 0x174   : > { %1495 = vmatmul.msk.f32.vlgmr.msra.gmra.mxu3 %vm767_vm3, %v1204_v41 }
 0x175   : > { %v1822_v16 = vsel %vm930_vm13, %v1554_v11, %v929_v15 }
 0x1b1   : > { %v878_v43 = vpop.f32.mrf.mxu2 }
 0x1b2   : > { %v879_v44 = vadd.f32 %v1548_v42, %v878_v43 }
 0x1b4   : > { %v901_v45 = vsel %vm900_vm11, %v879_v44, 0.0 }
 0x1b5   : > { %902 = vadd.xlane.f32.xlu0 %v901_v45 }
 0x1b9   : > { %v880_v46 = vpop.f32.mrf.mxu2 }
 0x1ba   : > { %v881_v47 = vadd.f32 %v1548_v42, %v880_v46 }
 0x1bc   : > { %v904_v48 = vsel %vm900_vm11, %v881_v47, 0.0 }
 0x1bd   : > { %905 = vadd.xlane.f32.xlu0 %v904_v48 }
 0x1c1   : > { %v883_v49 = vpop.f32.mrf.mxu2 }
 0x1c2   : > { %v884_v50 = vadd.f32 %v1548_v42, %v883_v49 }
 0x1c4   : > { %v907_v51 = vsel %vm900_vm11, %v884_v50, 0.0 }
 0x1c5   : > { %908 = vadd.xlane.f32.xlu1 %v907_v51 }
 0x1c9   : > { %v885_v52 = vpop.f32.mrf.mxu2 }
 0x1ca   : > { %v886_v53 = vadd.f32 %v1548_v42, %v885_v52 }
 0x1cc   : > { %v910_v54 = vsel %vm900_vm11, %v886_v53, 0.0 }
 0x1cd   : > { %911 = vadd.xlane.f32.xlu1 %v910_v54 }
 0x1d1   : > { %v888_v55 = vpop.f32.mrf.mxu2 }
 0x1d2   : > { %v889_v56 = vadd.f32 %v1548_v42, %v888_v55 }
 0x1d4   : > { %v913_v57 = vsel %vm900_vm11, %v889_v56, 0.0 }
 0x1d5   : > { %914 = vadd.xlane.f32.xlu2 %v913_v57 }
 0x1d9   : > { %v890_v58 = vpop.f32.mrf.mxu2 }
 0x1da   : > { %v891_v59 = vadd.f32 %v1548_v42, %v890_v58 }
 0x1dc   : > { %v916_v60 = vsel %vm900_vm11, %v891_v59, 0.0 }
 0x1dd   : > { %917 = vadd.xlane.f32.xlu2 %v916_v60 }
 0x1e7   : > { %v893_v61 = vpop.f32.mrf.mxu3 }
 0x1e8   : > { %v1807_v62 = vadd.f32 %v1548_v42, %v893_v61 }
 0x1ea   : > { %v919_v63 = vsel %vm900_vm11, %v1807_v62, 0.0 }
 0x1eb   : > { %920 = vadd.xlane.f32.xlu0 %v919_v63 }
 0x1ef   : > { %v895_v1 = vpop.f32.mrf.mxu3 }
 0x1f0   : > { %v1814_v2 = vadd.f32 %v1548_v42, %v895_v1 }
 0x1f2   : > { %v922_v4 = vsel %vm900_vm11, %v1814_v2, 0.0 }
 0x1f3   : > { %923 = vadd.xlane.f32.xlu1 %v922_v4 }
 0x1f7   : > { %v1224_v6 = vpop.f32.mrf.mxu3 }
 0x1f8   : > { %v1818_v8 = vadd.f32 %v1224_v6, %v1181_v5 }
 0x1fa   : > { %v1230_v9 = vsel %vm1229_vm12, %v1818_v8, 0.0 }
 0x1fb   : > { %1231 = vadd.xlane.f32.xlu2 %v1230_v9 }
 0x228   : > { %v903_v7 = vpop.xlane.xlu0 %902 }
 0x229   : > { %v932_v17 = vmul.f32 %v1822_v16, %v903_v7 }
 0x22b   : > { %v1825_v18 = vsub.f32 %v879_v44, %v932_v17  ;;  %v1601_v44 = vmov 6.0  }
 0x22c   : > { %1555 = vrcp.f32 %v1601_v44 }
 0x22d   : > { %v948_v19 = vmul.f32 %v1825_v18, %v1825_v18 }
 0x22f   : > { %v956_v20 = vsel %vm900_vm11, %v948_v19, 0.0 }
 0x230   : > { %957 = vadd.xlane.f32.xlu0 %v956_v20  ;;  %v906_v21 = vpop.xlane.xlu0 %905 }
 0x231   : > { %v933_v22 = vmul.f32 %v1822_v16, %v906_v21 }
 0x233   : > { %v1831_v23 = vsub.f32 %v881_v47, %v933_v22  ;;  %v1556_v47 = vpop.eup %1555 }
 0x234   : > { %v1234_v48 = vmul.f32 6.0, %v1556_v47  ;;  %vm1238_vm14 = vweird.f32 %v1556_v47 }
 0x235   : > { %v949_v24 = vmul.f32 %v1831_v23, %v1831_v23 }
 0x236   : > { %v1235_v51 = vsub.f32 1.0, %v1234_v48 }
 0x237   : > { %v959_v25 = vsel %vm900_vm11, %v949_v24, 0.0  ;;  %v1889_v24 = vld [vmem:[%s1979_s10] ss:$0 sm:$0xff] }
 0x238   : > { %v909_v26 = vpop.xlane.xlu1 %908  ;;  %960 = vadd.xlane.f32.xlu1 %v959_v25  ;;  %v1236_v54 = vmul.f32 %v1556_v47, %v1235_v51 }
 0x239   : > { %v934_v27 = vmul.f32 %v1822_v16, %v909_v26 }
 0x23a   : > { %v1237_v58 = vadd.f32 %v1556_v47, %v1236_v54 }
 0x23b   : > { %v1837_v28 = vsub.f32 %v884_v50, %v934_v27  ;;  %v1895_v27 = vld [vmem:[%s1980_s11] ss:$0 sm:$0xff] }
 0x23c   : > { %v1873_v61 = vsel %vm1238_vm14, %v1556_v47, %v1237_v58 }
 0x23d   : > { %v950_v29 = vmul.f32 %v1837_v28, %v1837_v28 }
 0x23f   : > { %v962_v30 = vsel %vm900_vm11, %v950_v29, 0.0 }
 0x240   : > { %963 = vadd.xlane.f32.xlu2 %v962_v30  ;;  %v912_v31 = vpop.xlane.xlu1 %911 }
 0x241   : > { %v935_v32 = vmul.f32 %v1822_v16, %v912_v31 }
 0x243   : > { %v1843_v33 = vsub.f32 %v886_v53, %v935_v32 }
 0x245   : > { %v951_v34 = vmul.f32 %v1843_v33, %v1843_v33 }
 0x247   : > { %v965_v35 = vsel %vm900_vm11, %v951_v34, 0.0 }
 0x248   : > { %v915_v36 = vpop.xlane.xlu2 %914  ;;  %966 = vadd.xlane.f32.xlu0 %v965_v35 }
 0x249   : > { %v936_v37 = vmul.f32 %v1822_v16, %v915_v36 }
 0x24b   : > { %v1849_v38 = vsub.f32 %v889_v56, %v936_v37 }
 0x24d   : > { %v952_v39 = vmul.f32 %v1849_v38, %v1849_v38 }
 0x24f   : > { %v968_v40 = vsel %vm900_vm11, %v952_v39, 0.0 }
 0x250   : > { %v918_v41 = vpop.xlane.xlu2 %917  ;;  %969 = vadd.xlane.f32.xlu1 %v968_v40 }
 0x251   : > { %v937_v42 = vmul.f32 %v1822_v16, %v918_v41 }
 0x253   : > { %v1855_v43 = vsub.f32 %v891_v59, %v937_v42 }
 0x255   : > { %v953_v45 = vmul.f32 %v1855_v43, %v1855_v43 }
 0x257   : > { %v971_v46 = vsel %vm900_vm11, %v953_v45, 0.0 }
 0x258   : > { %972 = vadd.xlane.f32.xlu2 %v971_v46 }
 0x25e   : > { %v921_v49 = vpop.xlane.xlu0 %920 }
 0x25f   : > { %v938_v50 = vmul.f32 %v1822_v16, %v921_v49 }
 0x261   : > { %v1862_v52 = vsub.f32 %v1807_v62, %v938_v50 }
 0x263   : > { %v954_v53 = vmul.f32 %v1862_v52, %v1862_v52 }
 0x265   : > { %v974_v55 = vsel %vm900_vm11, %v954_v53, 0.0 }
 0x266   : > { %v924_v56 = vpop.xlane.xlu1 %923  ;;  %975 = vadd.xlane.f32.xlu0 %v974_v55 }
 0x267   : > { %v939_v57 = vmul.f32 %v1822_v16, %v924_v56 }
 0x269   : > { %v1869_v59 = vsub.f32 %v1814_v2, %v939_v57 }
 0x26b   : > { %v955_v60 = vmul.f32 %v1869_v59, %v1869_v59 }
 0x26d   : > { %v977_v62 = vsel %vm900_vm11, %v955_v60, 0.0 }
 0x26e   : > { %v1232_v63 = vpop.xlane.xlu2 %1231  ;;  %978 = vadd.xlane.f32.xlu1 %v977_v62 }
 0x26f   : > { %v1240_v0 = vmul.f32 %v1873_v61, %v1232_v63 }
 0x271   : > { %v1878_v1 = vsub.f32 %v1818_v8, %v1240_v0 }
 0x273   : > { %v1242_v3 = vmul.f32 %v1878_v1, %v1878_v1 }
 0x275   : > { %v1243_v2 = vsel %vm1229_vm12, %v1242_v3, 0.0 }
 0x276   : > { %1244 = vadd.xlane.f32.xlu2 %v1243_v2 }
 0x2a3   : > { %v958_v4 = vpop.xlane.xlu0 %957 }
 0x2a4   : > { %v980_v5 = vmul.f32 %v958_v4, %v1822_v16 }
 0x2a6   : > { %v988_v6 = vadd.f32 1e-05, %v980_v5 }
 0x2a8   : > { %1557 = vrsqrt.f32 %v988_v6  ;;  %vm1002_vm0 = vweird.f32 %v988_v6 }
 0x2ab   : > { %v961_v9 = vpop.xlane.xlu1 %960 }
 0x2ac   : > { %v981_v10 = vmul.f32 %v961_v9, %v1822_v16 }
 0x2ae   : > { %v1558_v11 = vpop.eup %1557  ;;  %v989_v12 = vadd.f32 1e-05, %v981_v10 }
 0x2af   : > { %v997_v13 = vmul.f32 %v1558_v11, %v988_v6  ;;  %vm1003_vm15 = vweird.f32 %v1558_v11 }
 0x2b0   : > { %1559 = vrsqrt.f32 %v989_v12  ;;  %vm1004_vm1 = vmor %vm1002_vm0, %vm1003_vm15  ;;  %vm1012_vm3 = vweird.f32 %v989_v12 }
 0x2b1   : > { %v998_v8 = vmul.f32 %v1558_v11, %v997_v13 }
 0x2b3   : > { %v999_v14 = vmul.f32 0.5, %v998_v8  ;;  %v964_v15 = vpop.xlane.xlu2 %963 }
 0x2b4   : > { %v982_v7 = vmul.f32 %v964_v15, %v1822_v16 }
 0x2b5   : > { %v1000_v17 = vsub.f32 1.5, %v999_v14 }
 0x2b6   : > { %v1560_v19 = vpop.eup %1559  ;;  %v990_v20 = vadd.f32 1e-05, %v982_v7 }
 0x2b7   : > { %v1001_v21 = vmul.f32 %v1558_v11, %v1000_v17  ;;  %v1007_v22 = vmul.f32 %v1560_v19, %v989_v12  ;;  %vm1013_vm2 = vweird.f32 %v1560_v19 }
 0x2b8   : > { %1561 = vrsqrt.f32 %v990_v20  ;;  %vm1014_vm4 = vmor %vm1012_vm3, %vm1013_vm2  ;;  %vm1022_vm6 = vweird.f32 %v990_v20 }
 0x2b9   : > { %v1005_v25 = vsel %vm1004_vm1, %v1558_v11, %v1001_v21  ;;  %v1008_v26 = vmul.f32 %v1560_v19, %v1007_v22 }
 0x2ba   : > { %v1076_v29 = vmul.f32 %v1005_v25, %v1825_v18 }
 0x2bb   : > { %v1009_v30 = vmul.f32 0.5, %v1008_v26  ;;  %v967_v31 = vpop.xlane.xlu0 %966 }
 0x2bc   : > { %v1087_v32 = vmul.f32 %v1889_v24, %v1076_v29  ;;  %v983_v34 = vmul.f32 %v967_v31, %v1822_v16 }
 0x2bd   : > { %v1010_v35 = vsub.f32 1.5, %v1009_v30 }
 0x2be   : > { %v1562_v36 = vpop.eup %1561  ;;  %v1098_v37 = vadd.f32 %v1895_v27, %v1087_v32  ;;  %v991_v39 = vadd.f32 1e-05, %v983_v34 }
 0x2bf   : > { %v1011_v40 = vmul.f32 %v1560_v19, %v1010_v35  ;;  %v1017_v18 = vmul.f32 %v1562_v36, %v990_v20  ;;  %vm1023_vm5 = vweird.f32 %v1562_v36 }
 0x2c0   : > { %1106 = vst.msk [vmem:[%s1903_s29] sm:$0xff] %vm900_vm11, %v1098_v37  ;;  %1563 = vrsqrt.f32 %v991_v39  ;;  %vm1024_vm7 = vmor %vm1022_vm6, %vm1023_vm5  ;;  %vm1032_vm9 = vweird.f32 %v991_v39 }
 0x2c1   : > { %v1015_v41 = vsel %vm1014_vm4, %v1560_v19, %v1011_v40  ;;  %v1018_v42 = vmul.f32 %v1562_v36, %v1017_v18 }
 0x2c2   : > { %v1077_v44 = vmul.f32 %v1015_v41, %v1831_v23 }
 0x2c3   : > { %v1019_v45 = vmul.f32 0.5, %v1018_v42  ;;  %v970_v46 = vpop.xlane.xlu1 %969 }
 0x2c4   : > { %v1088_v47 = vmul.f32 %v1889_v24, %v1077_v44  ;;  %v984_v48 = vmul.f32 %v970_v46, %v1822_v16 }
 0x2c5   : > { %v1020_v49 = vsub.f32 1.5, %v1019_v45 }
 0x2c6   : > { %v1564_v50 = vpop.eup %1563  ;;  %v1099_v51 = vadd.f32 %v1895_v27, %v1088_v47  ;;  %v992_v53 = vadd.f32 1e-05, %v984_v48 }
 0x2c7   : > { %v1021_v54 = vmul.f32 %v1562_v36, %v1020_v49  ;;  %v1027_v55 = vmul.f32 %v1564_v50, %v991_v39  ;;  %vm1033_vm8 = vweird.f32 %v1564_v50 }
 0x2c8   : > { %1107 = vst.msk [vmem:[%s1903_s29 + $0x8] sm:$0xff] %vm900_vm11, %v1099_v51  ;;  %1565 = vrsqrt.f32 %v992_v53  ;;  %vm1034_vm10 = vmor %vm1032_vm9, %vm1033_vm8  ;;  %vm1042_vm14 = vweird.f32 %v992_v53 }
 0x2c9   : > { %v1025_v23 = vsel %vm1024_vm7, %v1562_v36, %v1021_v54  ;;  %v1028_v56 = vmul.f32 %v1564_v50, %v1027_v55 }
 0x2ca   : > { %v1078_v57 = vmul.f32 %v1025_v23, %v1837_v28 }
 0x2cb   : > { %v1029_v58 = vmul.f32 0.5, %v1028_v56  ;;  %v973_v60 = vpop.xlane.xlu2 %972 }
 0x2cc   : > { %v1089_v62 = vmul.f32 %v1889_v24, %v1078_v57  ;;  %v985_v63 = vmul.f32 %v973_v60, %v1822_v16 }
 0x2cd   : > { %v1030_v0 = vsub.f32 1.5, %v1029_v58 }
 0x2ce   : > { %v1566_v3 = vpop.eup %1565  ;;  %v1100_v2 = vadd.f32 %v1895_v27, %v1089_v62  ;;  %v993_v4 = vadd.f32 1e-05, %v985_v63 }
 0x2cf   : > { %v1031_v5 = vmul.f32 %v1564_v50, %v1030_v0  ;;  %v1037_v6 = vmul.f32 %v1566_v3, %v992_v53  ;;  %vm1043_vm13 = vweird.f32 %v1566_v3 }
 0x2d0   : > { %1108 = vst.msk [vmem:[%s1903_s29 + $0x10] sm:$0xff] %vm900_vm11, %v1100_v2  ;;  %1567 = vrsqrt.f32 %v993_v4  ;;  %vm1044_vm15 = vmor %vm1042_vm14, %vm1043_vm13  ;;  %vm1052_vm1 = vweird.f32 %v993_v4 }
 0x2d1   : > { %v1035_v28 = vsel %vm1034_vm10, %v1564_v50, %v1031_v5  ;;  %v1038_v9 = vmul.f32 %v1566_v3, %v1037_v6 }
 0x2d2   : > { %v1079_v10 = vmul.f32 %v1035_v28, %v1843_v33 }
 0x2d3   : > { %v1039_v11 = vmul.f32 0.5, %v1038_v9 }
 0x2d4   : > { %v1090_v12 = vmul.f32 %v1889_v24, %v1079_v10 }
 0x2d5   : > { %v1040_v13 = vsub.f32 1.5, %v1039_v11 }
 0x2d6   : > { %v1568_v8 = vpop.eup %1567  ;;  %v1101_v14 = vadd.f32 %v1895_v27, %v1090_v12 }
 0x2d7   : > { %v1041_v15 = vmul.f32 %v1566_v3, %v1040_v13  ;;  %v1047_v7 = vmul.f32 %v1568_v8, %v993_v4  ;;  %vm1053_vm0 = vweird.f32 %v1568_v8  ;;  %v1551_v4 = vld [vmem:[%s1981_s12] ss:$0 sm:$0xff] }
 0x2d8   : > { %1109 = vst.msk [vmem:[%s1903_s29 + $0x18] sm:$0xff] %vm900_vm11, %v1101_v14  ;;  %vm1054_vm2 = vmor %vm1052_vm1, %vm1053_vm0 }
 0x2d9   : > { %v1045_v17 = vsel %vm1044_vm15, %v1566_v3, %v1041_v15  ;;  %v1048_v19 = vmul.f32 %v1568_v8, %v1047_v7  ;;  %v976_v20 = vpop.xlane.xlu0 %975 }
 0x2da   : > { %v1080_v33 = vmul.f32 %v1045_v17, %v1849_v38  ;;  %v986_v21 = vmul.f32 %v976_v20, %v1822_v16 }
 0x2db   : > { %v1049_v22 = vmul.f32 0.5, %v1048_v19 }
 0x2dc   : > { %v1091_v25 = vmul.f32 %v1889_v24, %v1080_v33  ;;  %v994_v26 = vadd.f32 1e-05, %v986_v21 }
 0x2dd   : > { %v1050_v29 = vsub.f32 1.5, %v1049_v22 }
 0x2de   : > { %v1102_v30 = vadd.f32 %v1895_v27, %v1091_v25  ;;  %1569 = vrsqrt.f32 %v994_v26  ;;  %vm1062_vm4 = vweird.f32 %v994_v26 }
 0x2df   : > { %v1051_v31 = vmul.f32 %v1568_v8, %v1050_v29 }
 0x2e0   : > { %1110 = vst.msk [vmem:[%s1903_s29 + $0x20] sm:$0xff] %vm900_vm11, %v1102_v30 }
 0x2e1   : > { %v1055_v32 = vsel %vm1054_vm2, %v1568_v8, %v1051_v31  ;;  %v979_v34 = vpop.xlane.xlu1 %978 }
 0x2e2   : > { %v1081_v38 = vmul.f32 %v1055_v32, %v1855_v43  ;;  %v987_v35 = vmul.f32 %v979_v34, %v1822_v16 }
 0x2e4   : > { %v1570_v36 = vpop.eup %1569  ;;  %v1092_v37 = vmul.f32 %v1889_v24, %v1081_v38  ;;  %v995_v39 = vadd.f32 1e-05, %v987_v35 }
 0x2e5   : > { %v1057_v40 = vmul.f32 %v1570_v36, %v994_v26  ;;  %vm1063_vm3 = vweird.f32 %v1570_v36 }
 0x2e6   : > { %v1103_v18 = vadd.f32 %v1895_v27, %v1092_v37  ;;  %1571 = vrsqrt.f32 %v995_v39  ;;  %vm1064_vm5 = vmor %vm1062_vm4, %vm1063_vm3  ;;  %vm1072_vm7 = vweird.f32 %v995_v39 }
 0x2e7   : > { %v1058_v41 = vmul.f32 %v1570_v36, %v1057_v40 }
 0x2e8   : > { %1111 = vst.msk [vmem:[%s1903_s29 + $0x28] sm:$0xff] %vm900_vm11, %v1103_v18 }
 0x2e9   : > { %v1059_v42 = vmul.f32 0.5, %v1058_v41  ;;  %v1245_v44 = vpop.xlane.xlu2 %1244 }
 0x2ea   : > { %v1246_v45 = vmul.f32 %v1245_v44, %v1873_v61 }
 0x2eb   : > { %v1060_v46 = vsub.f32 1.5, %v1059_v42 }
 0x2ec   : > { %v1572_v43 = vpop.eup %1571  ;;  %v1247_v47 = vadd.f32 1e-05, %v1246_v45 }
 0x2ed   : > { %v1061_v16 = vmul.f32 %v1570_v36, %v1060_v46  ;;  %v1067_v48 = vmul.f32 %v1572_v43, %v995_v39  ;;  %vm1073_vm6 = vweird.f32 %v1572_v43 }
 0x2ee   : > { %1573 = vrsqrt.f32 %v1247_v47  ;;  %vm1074_vm8 = vmor %vm1072_vm7, %vm1073_vm6  ;;  %vm1254_vm10 = vweird.f32 %v1247_v47 }
 0x2ef   : > { %v1065_v49 = vsel %vm1064_vm5, %v1570_v36, %v1061_v16  ;;  %v1068_v50 = vmul.f32 %v1572_v43, %v1067_v48 }
 0x2f0   : > { %v1082_v51 = vmul.f32 %v1065_v49, %v1862_v52 }
 0x2f1   : > { %v1069_v53 = vmul.f32 0.5, %v1068_v50 }
 0x2f2   : > { %v1093_v54 = vmul.f32 %v1889_v24, %v1082_v51 }
 0x2f3   : > { %v1070_v55 = vsub.f32 1.5, %v1069_v53 }
 0x2f4   : > { %v1574_v61 = vpop.eup %1573  ;;  %v1104_v23 = vadd.f32 %v1895_v27, %v1093_v54 }
 0x2f5   : > { %v1071_v56 = vmul.f32 %v1572_v43, %v1070_v55  ;;  %v1249_v57 = vmul.f32 %v1574_v61, %v1247_v47  ;;  %vm1255_vm9 = vweird.f32 %v1574_v61 }
 0x2f6   : > { %1112 = vst.msk [vmem:[%s1903_s29 + $0x30] sm:$0xff] %vm900_vm11, %v1104_v23  ;;  %vm1256_vm13 = vmor %vm1254_vm10, %vm1255_vm9 }
 0x2f7   : > { %v1075_v58 = vsel %vm1074_vm8, %v1572_v43, %v1071_v56  ;;  %v1250_v60 = vmul.f32 %v1574_v61, %v1249_v57 }
 0x2f8   : > { %v1083_v52 = vmul.f32 %v1075_v58, %v1869_v59  ;;  %v1552_v59 = vld [vmem:[%s1982_s13] ss:$0 sm:$0xff] }
 0x2f9   : > { %v1251_v62 = vmul.f32 0.5, %v1250_v60 }
 0x2fa   : > { %v1094_v63 = vmul.f32 %v1889_v24, %v1083_v52 }
 0x2fb   : > { %v1252_v0 = vsub.f32 1.5, %v1251_v62 }
 0x2fc   : > { %v1105_v3 = vadd.f32 %v1895_v27, %v1094_v63 }
 0x2fd   : > { %v1253_v2 = vmul.f32 %v1574_v61, %v1252_v0 }
 0x2fe   : > { %1113 = vst.msk [vmem:[%s1903_s29 + $0x38] sm:$0xff] %vm900_vm11, %v1105_v3 }
 0x2ff   : > { %v1257_v5 = vsel %vm1256_vm13, %v1574_v61, %v1253_v2 }
 0x300   : > { %v1258_v24 = vmul.f32 %v1257_v5, %v1878_v1 }
 0x302   : > { %v1262_v6 = vmul.f32 %v1551_v4, %v1258_v24 }
 0x304   : > { %v1266_v27 = vadd.f32 %v1552_v59, %v1262_v6 }
 0x306   : > { %1267 = vst.msk [vmem:[%s587_s24] sm:$0xff] %vm1229_vm12, %v1266_v27 }
 0x307 PF: > { %s26_s20 = sadd.s32 1, %s1597_s20   ;;  %s1985_s18 = smov %s1593_s19 }
 0x308   : > { %p23_p5 = scmp.ge.s32.totalorder %s26_s20, 4   ;;  %s1986_s19 = smov %s1988_s21 }
 0x30a   :  { %25 = sbr.rel (!%p23_p5) target bundleno = 2 (0x2), region = 124 }

</bundles_post_ra>
